<compile_context>
chip_gen: v6e
topology: v6e:2x2x1
jax: 0.10.0
libtpu: 0.0.40
codegen_flags: <defaults>
</compile_context>

<pallas_src>
import math

import jax
import jax.numpy as jnp
from jax.experimental import pallas as pl
from jax.experimental.pallas import tpu as pltpu


# ---------------------------------------------------------------------------
# Fused kernel: u_predict (per-capsule MXU matmuls into VMEM scratch) + routing
# ---------------------------------------------------------------------------
def _make_caps_kernel(n_iterations, ic_total, ic_tile, oc, od):
    def softmax_last(x):
        x = x - jnp.max(x, axis=-1, keepdims=True)
        e = jnp.exp(x)
        return e / jnp.sum(e, axis=-1, keepdims=True)

    def squash(s):
        # scale = n2 / (1 + n2) * rsqrt(n2); rsqrt goes to the EUP slot and the
        # tiny eps guards the zero-vector NaN of the reference formulation.
        n2 = jnp.sum(s * s, axis=-1, keepdims=True)
        return s * (n2 * jax.lax.rsqrt(n2 + 1e-9) / (1.0 + n2))

    def kernel(x_ref, w_ref, b_ref, v_ref, u_scratch):
        # x_ref:     (BT, IC_TILE, Din)   caps_output block, native layout
        # w_ref:     (IC_TILE, Din, OC*OD)
        # b_ref:     (IC, OC)             routing prior (AgreementRouting.b)
        # v_ref:     (BT, OC, OD)         output block (same block across ic axis)
        # u_scratch: (IC, BT, OC*OD)      persistent VMEM accumulator of u_predict
        ici = pl.program_id(1)
        base = ici * ic_tile

        # ---- u_predict for this capsule tile: IC_TILE 2-D MXU matmuls -------
        # TODO(synk): optionally cast x/w to bf16 here (keep f32 accumulation)
        # for ~2x HBM/MXU throughput on v6e/v7x; kept f32 for exactness.
        for t in range(ic_tile):
            u_t = jnp.dot(
                x_ref[:, t, :], w_ref[t], preferred_element_type=jnp.float32
            )  # (BT, OC*OD)
            u_scratch[base + t] = u_t

        # ---- routing: once per batch tile, after all capsules are written ---
        @pl.when(ici == pl.num_programs(1) - 1)
        def _routing():
            bt = v_ref.shape[0]
            u = u_scratch[...].reshape(ic_total, bt, oc, od)   # (IC, BT, OC, OD)
            b0 = b_ref[...]                                    # (IC, OC)

            # iteration 0: c = softmax(b); s = sum_i c * u; v = squash(s)
            c0 = softmax_last(b0)                              # (IC, OC)
            s = jnp.sum(c0[:, None, :, None] * u, axis=0)      # (BT, OC, OD)
            v = squash(s)

            # TODO(synk): for large IC the two reductions below could be mapped
            # onto the MXU (contractions over IC / OD); kept as VPU/XLU
            # broadcast-reduce here for robust lowering at small OC/OD.
            b_batch = b0[:, None, :]                           # (IC, 1, OC)
            for _ in range(n_iterations):                      # static unroll
                b_batch = b_batch + jnp.sum(u * v[None], axis=-1)  # (IC, BT, OC)
                c = softmax_last(b_batch)                           # (IC, BT, OC)
                s = jnp.sum(c[..., None] * u, axis=0)               # (BT, OC, OD)
                v = squash(s)

            v_ref[...] = v.astype(v_ref.dtype)

    return kernel


# ---------------------------------------------------------------------------
# Wrapper
# ---------------------------------------------------------------------------
def _largest_divisor_leq(n, cap):
    t = max(1, min(n, cap))
    while n % t:
        t -= 1
    return t


def caps_layer_forward(caps_output, weights, routing_b, n_iterations,
                       *, batch_tile=None, ic_tile=None):
    B, IC, Din = caps_output.shape
    IC_w, Din_w, OCOD = weights.shape
    assert (IC_w, Din_w) == (IC, Din)
    OC = routing_b.shape[1]
    assert OCOD % OC == 0
    OD = OCOD // OC

    if batch_tile is None:
        # Keep the persistent u_predict scratch within a conservative VMEM
        # budget (v7x has only 64 MiB physical VMEM); cap M-dim tile at 128.
        budget = 24 * 1024 * 1024
        max_bt = max(1, budget // (IC * OCOD * 4))
        batch_tile = _largest_divisor_leq(B, min(128, max_bt))
    if ic_tile is None:
        # x's block 2nd-to-last dim must be a multiple of 8 or the full IC.
        for cand in (32, 16, 8):
            if IC % cand == 0 and IC >= cand:
                ic_tile = cand
                break
        else:
            ic_tile = IC
    assert B % batch_tile == 0 and IC % ic_tile == 0

    grid = (B // batch_tile, IC // ic_tile)
    kernel = _make_caps_kernel(n_iterations, IC, ic_tile, OC, OD)

    v = pl.pallas_call(
        kernel,
        out_shape=jax.ShapeDtypeStruct((B, OC, OD), jnp.float32),
        grid=grid,
        in_specs=[
            # caps_output read in its native (B, IC, Din) layout: no XLA transpose.
            pl.BlockSpec((batch_tile, ic_tile, Din), lambda bi, ici: (bi, ici, 0)),
            pl.BlockSpec((ic_tile, Din, OCOD), lambda bi, ici: (ici, 0, 0)),
            pl.BlockSpec((IC, OC), lambda bi, ici: (0, 0)),
        ],
        out_specs=pl.BlockSpec((batch_tile, OC, OD), lambda bi, ici: (bi, 0, 0)),
        scratch_shapes=[pltpu.VMEM((IC, batch_tile, OCOD), jnp.float32)],
        compiler_params=pltpu.CompilerParams(
            dimension_semantics=("parallel", "arbitrary"),
            vmem_limit_bytes=64 * 1024 * 1024,
        ),
    )(caps_output, weights, routing_b)

    return v


# ---------------------------------------------------------------------------
# Pure-JAX reference (mirrors the PyTorch forward exactly)
# ---------------------------------------------------------------------------
def _reference(caps_output, weights, routing_b, n_iterations):
    B, IC, Din = caps_output.shape
    OC = routing_b.shape[1]
    OD = weights.shape[2] // OC
    u = jnp.einsum("bid,ido->bio", caps_output, weights).reshape(B, IC, OC, OD)

    def squash(s):
        n2 = jnp.sum(s * s, axis=-1, keepdims=True)
        return s * (n2 / (1.0 + n2) / jnp.sqrt(n2))

    c = jax.nn.softmax(routing_b, axis=1)
    s = jnp.sum(c[None, :, :, None] * u, axis=1)
    v = squash(s)
    b_batch = jnp.broadcast_to(routing_b, (B, IC, OC))
    for _ in range(n_iterations):
        b_batch = b_batch + jnp.sum(u * v[:, None, :, :], axis=-1)
        c = jax.nn.softmax(b_batch, axis=-1)
        s = jnp.sum(c[..., None] * u, axis=1)
        v = squash(s)
    return v


if __name__ == "__main__":
    # Small shapes consistent with CapsLayer(input_caps, input_dim, output_caps, output_dim)
    B, IC, Din, OC, OD = 2, 8, 16, 4, 8
    N_ITER = 3

    key = jax.random.PRNGKey(0)
    kx, kw = jax.random.split(key)

    caps_output = jax.random.normal(kx, (B, IC, Din), dtype=jnp.float32)

    # Deterministic parameter init matching reset_parameters(): U(-stdv, stdv)
    stdv = 1.0 / math.sqrt(IC)
    weights = jax.random.uniform(
        kw, (IC, Din, OC * OD), minval=-stdv, maxval=stdv, dtype=jnp.float32
    )
    routing_b = jnp.zeros((IC, OC), dtype=jnp.float32)  # AgreementRouting.b

    v = caps_layer_forward(caps_output, weights, routing_b, N_ITER)
    v = jax.block_until_ready(v)

    v_ref = _reference(caps_output, weights, routing_b, N_ITER)
    assert v.shape == (B, OC, OD)
    assert jnp.allclose(v, v_ref, atol=1e-5, rtol=1e-5), (
        f"max abs err {jnp.max(jnp.abs(v - v_ref))}"
    )

    print("KERNEL_OK")
</pallas_src>

<mosaic_0001>
module attributes {stable_mosaic.version = 11 : i64} {
  func.func @kernel(%arg0: i32, %arg1: i32, %arg2: memref<2x8x16xf32, #tpu.memory_space<vmem>>, %arg3: memref<8x16x32xf32, #tpu.memory_space<vmem>>, %arg4: memref<8x4xf32, #tpu.memory_space<vmem>>, %arg5: memref<2x4x8xf32, #tpu.memory_space<vmem>>, %arg6: memref<8x2x32xf32, #tpu.memory_space<vmem>>) attributes {dimension_semantics = [#tpu.dimension_semantics<parallel>, #tpu.dimension_semantics<arbitrary>], iteration_bounds = array<i64: 1, 1>, scalar_prefetch = 0 : i64, scratch_operands = 1 : i64, tpu.core_type = #tpu.core_type<tc>, window_params = [{transform_indices = @transform_0, window_bounds = array<i64: 2, 8, 16>}, {transform_indices = @transform_1, window_bounds = array<i64: 8, 16, 32>}, {pipeline_mode = #tpu.pipeline_mode<synchronous>, transform_indices = @transform_2, window_bounds = array<i64: 8, 4>}, {transform_indices = @transform_3, window_bounds = array<i64: 2, 4, 8>}]} {
    %c8_i32 = arith.constant 8 : i32
    %0 = arith.muli %arg1, %c8_i32 : i32
    %c0 = arith.constant 0 : index
    %c0_0 = arith.constant 0 : index
    %c0_1 = arith.constant 0 : index
    %1 = vector.load %arg2[%c0, %c0_0, %c0_1] : memref<2x8x16xf32, #tpu.memory_space<vmem>>, vector<2x1x16xf32>
    %2 = vector.shape_cast %1 : vector<2x1x16xf32> to vector<2x16xf32>
    %c0_2 = arith.constant 0 : index
    %c0_3 = arith.constant 0 : index
    %c0_4 = arith.constant 0 : index
    %3 = vector.load %arg3[%c0_2, %c0_3, %c0_4] : memref<8x16x32xf32, #tpu.memory_space<vmem>>, vector<1x16x32xf32>
    %4 = vector.shape_cast %3 : vector<1x16x32xf32> to vector<16x32xf32>
    %cst = arith.constant dense<0.000000e+00> : vector<2x32xf32>
    %5 = tpu.matmul %2, %4, %cst {dimension_numbers = #tpu.dot_dimension_numbers<[1], [0], [0], [1], [0, 0, 1, 1], [], []>} : vector<2x16xf32>, vector<16x32xf32>, vector<2x32xf32> -> vector<2x32xf32>
    %c0_i32 = arith.constant 0 : i32
    %6 = arith.addi %0, %c0_i32 : i32
    %7 = arith.index_cast %6 : i32 to index
    %c0_5 = arith.constant 0 : index
    %c0_6 = arith.constant 0 : index
    %8 = vector.load %arg6[%7, %c0_5, %c0_6] : memref<8x2x32xf32, #tpu.memory_space<vmem>>, vector<1x2x32xf32>
    %9 = vector.shape_cast %8 : vector<1x2x32xf32> to vector<2x32xf32>
    %10 = vector.shape_cast %5 : vector<2x32xf32> to vector<1x2x32xf32>
    tpu.vector_store %arg6[%7, %c0_5, %c0_6], %10 {strides = array<i32>} : memref<8x2x32xf32, #tpu.memory_space<vmem>>, vector<1x2x32xf32>,
    %c0_7 = arith.constant 0 : index
    %c1 = arith.constant 1 : index
    %c0_8 = arith.constant 0 : index
    %11 = vector.load %arg2[%c0_7, %c1, %c0_8] : memref<2x8x16xf32, #tpu.memory_space<vmem>>, vector<2x1x16xf32>
    %12 = vector.shape_cast %11 : vector<2x1x16xf32> to vector<2x16xf32>
    %c1_9 = arith.constant 1 : index
    %c0_10 = arith.constant 0 : index
    %c0_11 = arith.constant 0 : index
    %13 = vector.load %arg3[%c1_9, %c0_10, %c0_11] : memref<8x16x32xf32, #tpu.memory_space<vmem>>, vector<1x16x32xf32>
    %14 = vector.shape_cast %13 : vector<1x16x32xf32> to vector<16x32xf32>
    %cst_12 = arith.constant dense<0.000000e+00> : vector<2x32xf32>
    %15 = tpu.matmul %12, %14, %cst_12 {dimension_numbers = #tpu.dot_dimension_numbers<[1], [0], [0], [1], [0, 0, 1, 1], [], []>} : vector<2x16xf32>, vector<16x32xf32>, vector<2x32xf32> -> vector<2x32xf32>
    %c1_i32 = arith.constant 1 : i32
    %16 = arith.addi %0, %c1_i32 : i32
    %17 = arith.index_cast %16 : i32 to index
    %c0_13 = arith.constant 0 : index
    %c0_14 = arith.constant 0 : index
    %18 = vector.load %arg6[%17, %c0_13, %c0_14] : memref<8x2x32xf32, #tpu.memory_space<vmem>>, vector<1x2x32xf32>
    %19 = vector.shape_cast %18 : vector<1x2x32xf32> to vector<2x32xf32>
    %20 = vector.shape_cast %15 : vector<2x32xf32> to vector<1x2x32xf32>
    tpu.vector_store %arg6[%17, %c0_13, %c0_14], %20 {strides = array<i32>} : memref<8x2x32xf32, #tpu.memory_space<vmem>>, vector<1x2x32xf32>,
    %c0_15 = arith.constant 0 : index
    %c2 = arith.constant 2 : index
    %c0_16 = arith.constant 0 : index
    %21 = vector.load %arg2[%c0_15, %c2, %c0_16] : memref<2x8x16xf32, #tpu.memory_space<vmem>>, vector<2x1x16xf32>
    %22 = vector.shape_cast %21 : vector<2x1x16xf32> to vector<2x16xf32>
    %c2_17 = arith.constant 2 : index
    %c0_18 = arith.constant 0 : index
    %c0_19 = arith.constant 0 : index
    %23 = vector.load %arg3[%c2_17, %c0_18, %c0_19] : memref<8x16x32xf32, #tpu.memory_space<vmem>>, vector<1x16x32xf32>
    %24 = vector.shape_cast %23 : vector<1x16x32xf32> to vector<16x32xf32>
    %cst_20 = arith.constant dense<0.000000e+00> : vector<2x32xf32>
    %25 = tpu.matmul %22, %24, %cst_20 {dimension_numbers = #tpu.dot_dimension_numbers<[1], [0], [0], [1], [0, 0, 1, 1], [], []>} : vector<2x16xf32>, vector<16x32xf32>, vector<2x32xf32> -> vector<2x32xf32>
    %c2_i32 = arith.constant 2 : i32
    %26 = arith.addi %0, %c2_i32 : i32
    %27 = arith.index_cast %26 : i32 to index
    %c0_21 = arith.constant 0 : index
    %c0_22 = arith.constant 0 : index
    %28 = vector.load %arg6[%27, %c0_21, %c0_22] : memref<8x2x32xf32, #tpu.memory_space<vmem>>, vector<1x2x32xf32>
    %29 = vector.shape_cast %28 : vector<1x2x32xf32> to vector<2x32xf32>
    %30 = vector.shape_cast %25 : vector<2x32xf32> to vector<1x2x32xf32>
    tpu.vector_store %arg6[%27, %c0_21, %c0_22], %30 {strides = array<i32>} : memref<8x2x32xf32, #tpu.memory_space<vmem>>, vector<1x2x32xf32>,
    %c0_23 = arith.constant 0 : index
    %c3 = arith.constant 3 : index
    %c0_24 = arith.constant 0 : index
    %31 = vector.load %arg2[%c0_23, %c3, %c0_24] : memref<2x8x16xf32, #tpu.memory_space<vmem>>, vector<2x1x16xf32>
    %32 = vector.shape_cast %31 : vector<2x1x16xf32> to vector<2x16xf32>
    %c3_25 = arith.constant 3 : index
    %c0_26 = arith.constant 0 : index
    %c0_27 = arith.constant 0 : index
    %33 = vector.load %arg3[%c3_25, %c0_26, %c0_27] : memref<8x16x32xf32, #tpu.memory_space<vmem>>, vector<1x16x32xf32>
    %34 = vector.shape_cast %33 : vector<1x16x32xf32> to vector<16x32xf32>
    %cst_28 = arith.constant dense<0.000000e+00> : vector<2x32xf32>
    %35 = tpu.matmul %32, %34, %cst_28 {dimension_numbers = #tpu.dot_dimension_numbers<[1], [0], [0], [1], [0, 0, 1, 1], [], []>} : vector<2x16xf32>, vector<16x32xf32>, vector<2x32xf32> -> vector<2x32xf32>
    %c3_i32 = arith.constant 3 : i32
    %36 = arith.addi %0, %c3_i32 : i32
    %37 = arith.index_cast %36 : i32 to index
    %c0_29 = arith.constant 0 : index
    %c0_30 = arith.constant 0 : index
    %38 = vector.load %arg6[%37, %c0_29, %c0_30] : memref<8x2x32xf32, #tpu.memory_space<vmem>>, vector<1x2x32xf32>
    %39 = vector.shape_cast %38 : vector<1x2x32xf32> to vector<2x32xf32>
    %40 = vector.shape_cast %35 : vector<2x32xf32> to vector<1x2x32xf32>
    tpu.vector_store %arg6[%37, %c0_29, %c0_30], %40 {strides = array<i32>} : memref<8x2x32xf32, #tpu.memory_space<vmem>>, vector<1x2x32xf32>,
    %c0_31 = arith.constant 0 : index
    %c4 = arith.constant 4 : index
    %c0_32 = arith.constant 0 : index
    %41 = vector.load %arg2[%c0_31, %c4, %c0_32] : memref<2x8x16xf32, #tpu.memory_space<vmem>>, vector<2x1x16xf32>
    %42 = vector.shape_cast %41 : vector<2x1x16xf32> to vector<2x16xf32>
    %c4_33 = arith.constant 4 : index
    %c0_34 = arith.constant 0 : index
    %c0_35 = arith.constant 0 : index
    %43 = vector.load %arg3[%c4_33, %c0_34, %c0_35] : memref<8x16x32xf32, #tpu.memory_space<vmem>>, vector<1x16x32xf32>
    %44 = vector.shape_cast %43 : vector<1x16x32xf32> to vector<16x32xf32>
    %cst_36 = arith.constant dense<0.000000e+00> : vector<2x32xf32>
    %45 = tpu.matmul %42, %44, %cst_36 {dimension_numbers = #tpu.dot_dimension_numbers<[1], [0], [0], [1], [0, 0, 1, 1], [], []>} : vector<2x16xf32>, vector<16x32xf32>, vector<2x32xf32> -> vector<2x32xf32>
    %c4_i32 = arith.constant 4 : i32
    %46 = arith.addi %0, %c4_i32 : i32
    %47 = arith.index_cast %46 : i32 to index
    %c0_37 = arith.constant 0 : index
    %c0_38 = arith.constant 0 : index
    %48 = vector.load %arg6[%47, %c0_37, %c0_38] : memref<8x2x32xf32, #tpu.memory_space<vmem>>, vector<1x2x32xf32>
    %49 = vector.shape_cast %48 : vector<1x2x32xf32> to vector<2x32xf32>
    %50 = vector.shape_cast %45 : vector<2x32xf32> to vector<1x2x32xf32>
    tpu.vector_store %arg6[%47, %c0_37, %c0_38], %50 {strides = array<i32>} : memref<8x2x32xf32, #tpu.memory_space<vmem>>, vector<1x2x32xf32>,
    %c0_39 = arith.constant 0 : index
    %c5 = arith.constant 5 : index
    %c0_40 = arith.constant 0 : index
    %51 = vector.load %arg2[%c0_39, %c5, %c0_40] : memref<2x8x16xf32, #tpu.memory_space<vmem>>, vector<2x1x16xf32>
    %52 = vector.shape_cast %51 : vector<2x1x16xf32> to vector<2x16xf32>
    %c5_41 = arith.constant 5 : index
    %c0_42 = arith.constant 0 : index
    %c0_43 = arith.constant 0 : index
    %53 = vector.load %arg3[%c5_41, %c0_42, %c0_43] : memref<8x16x32xf32, #tpu.memory_space<vmem>>, vector<1x16x32xf32>
    %54 = vector.shape_cast %53 : vector<1x16x32xf32> to vector<16x32xf32>
    %cst_44 = arith.constant dense<0.000000e+00> : vector<2x32xf32>
    %55 = tpu.matmul %52, %54, %cst_44 {dimension_numbers = #tpu.dot_dimension_numbers<[1], [0], [0], [1], [0, 0, 1, 1], [], []>} : vector<2x16xf32>, vector<16x32xf32>, vector<2x32xf32> -> vector<2x32xf32>
    %c5_i32 = arith.constant 5 : i32
    %56 = arith.addi %0, %c5_i32 : i32
    %57 = arith.index_cast %56 : i32 to index
    %c0_45 = arith.constant 0 : index
    %c0_46 = arith.constant 0 : index
    %58 = vector.load %arg6[%57, %c0_45, %c0_46] : memref<8x2x32xf32, #tpu.memory_space<vmem>>, vector<1x2x32xf32>
    %59 = vector.shape_cast %58 : vector<1x2x32xf32> to vector<2x32xf32>
    %60 = vector.shape_cast %55 : vector<2x32xf32> to vector<1x2x32xf32>
    tpu.vector_store %arg6[%57, %c0_45, %c0_46], %60 {strides = array<i32>} : memref<8x2x32xf32, #tpu.memory_space<vmem>>, vector<1x2x32xf32>,
    %c0_47 = arith.constant 0 : index
    %c6 = arith.constant 6 : index
    %c0_48 = arith.constant 0 : index
    %61 = vector.load %arg2[%c0_47, %c6, %c0_48] : memref<2x8x16xf32, #tpu.memory_space<vmem>>, vector<2x1x16xf32>
    %62 = vector.shape_cast %61 : vector<2x1x16xf32> to vector<2x16xf32>
    %c6_49 = arith.constant 6 : index
    %c0_50 = arith.constant 0 : index
    %c0_51 = arith.constant 0 : index
    %63 = vector.load %arg3[%c6_49, %c0_50, %c0_51] : memref<8x16x32xf32, #tpu.memory_space<vmem>>, vector<1x16x32xf32>
    %64 = vector.shape_cast %63 : vector<1x16x32xf32> to vector<16x32xf32>
    %cst_52 = arith.constant dense<0.000000e+00> : vector<2x32xf32>
    %65 = tpu.matmul %62, %64, %cst_52 {dimension_numbers = #tpu.dot_dimension_numbers<[1], [0], [0], [1], [0, 0, 1, 1], [], []>} : vector<2x16xf32>, vector<16x32xf32>, vector<2x32xf32> -> vector<2x32xf32>
    %c6_i32 = arith.constant 6 : i32
    %66 = arith.addi %0, %c6_i32 : i32
    %67 = arith.index_cast %66 : i32 to index
    %c0_53 = arith.constant 0 : index
    %c0_54 = arith.constant 0 : index
    %68 = vector.load %arg6[%67, %c0_53, %c0_54] : memref<8x2x32xf32, #tpu.memory_space<vmem>>, vector<1x2x32xf32>
    %69 = vector.shape_cast %68 : vector<1x2x32xf32> to vector<2x32xf32>
    %70 = vector.shape_cast %65 : vector<2x32xf32> to vector<1x2x32xf32>
    tpu.vector_store %arg6[%67, %c0_53, %c0_54], %70 {strides = array<i32>} : memref<8x2x32xf32, #tpu.memory_space<vmem>>, vector<1x2x32xf32>,
    %c0_55 = arith.constant 0 : index
    %c7 = arith.constant 7 : index
    %c0_56 = arith.constant 0 : index
    %71 = vector.load %arg2[%c0_55, %c7, %c0_56] : memref<2x8x16xf32, #tpu.memory_space<vmem>>, vector<2x1x16xf32>
    %72 = vector.shape_cast %71 : vector<2x1x16xf32> to vector<2x16xf32>
    %c7_57 = arith.constant 7 : index
    %c0_58 = arith.constant 0 : index
    %c0_59 = arith.constant 0 : index
    %73 = vector.load %arg3[%c7_57, %c0_58, %c0_59] : memref<8x16x32xf32, #tpu.memory_space<vmem>>, vector<1x16x32xf32>
    %74 = vector.shape_cast %73 : vector<1x16x32xf32> to vector<16x32xf32>
    %cst_60 = arith.constant dense<0.000000e+00> : vector<2x32xf32>
    %75 = tpu.matmul %72, %74, %cst_60 {dimension_numbers = #tpu.dot_dimension_numbers<[1], [0], [0], [1], [0, 0, 1, 1], [], []>} : vector<2x16xf32>, vector<16x32xf32>, vector<2x32xf32> -> vector<2x32xf32>
    %c7_i32 = arith.constant 7 : i32
    %76 = arith.addi %0, %c7_i32 : i32
    %77 = arith.index_cast %76 : i32 to index
    %c0_61 = arith.constant 0 : index
    %c0_62 = arith.constant 0 : index
    %78 = vector.load %arg6[%77, %c0_61, %c0_62] : memref<8x2x32xf32, #tpu.memory_space<vmem>>, vector<1x2x32xf32>
    %79 = vector.shape_cast %78 : vector<1x2x32xf32> to vector<2x32xf32>
    %80 = vector.shape_cast %75 : vector<2x32xf32> to vector<1x2x32xf32>
    tpu.vector_store %arg6[%77, %c0_61, %c0_62], %80 {strides = array<i32>} : memref<8x2x32xf32, #tpu.memory_space<vmem>>, vector<1x2x32xf32>,
    %c0_i32_63 = arith.constant 0 : i32
    %81 = arith.cmpi eq, %arg1, %c0_i32_63 : i32
    %82 = arith.extui %81 : i1 to i32
    %c0_i32_64 = arith.constant 0 : i32
    %83 = arith.cmpi ne, %82, %c0_i32_64 : i32
    scf.if %83 {
      %c0_65 = arith.constant 0 : index
      %c0_66 = arith.constant 0 : index
      %c0_67 = arith.constant 0 : index
      %84 = vector.load %arg6[%c0_65, %c0_66, %c0_67] : memref<8x2x32xf32, #tpu.memory_space<vmem>>, vector<8x2x32xf32>
      %85 = vector.shape_cast %84 : vector<8x2x32xf32> to vector<8x2x4x8xf32>
      %c0_68 = arith.constant 0 : index
      %c0_69 = arith.constant 0 : index
      %86 = vector.load %arg4[%c0_68, %c0_69] : memref<8x4xf32, #tpu.memory_space<vmem>>, vector<8x4xf32>
      %cst_70 = arith.constant dense<0xFF800000> : vector<8xf32>
      %87 = vector.multi_reduction <maximumf>, %86, %cst_70 [1] : vector<8x4xf32> to vector<8xf32>
      %88 = vector.shape_cast %87 : vector<8xf32> to vector<8x1xf32>
      %89 = vector.broadcast %88 : vector<8x1xf32> to vector<8x4xf32>
      %90 = arith.subf %86, %89 : vector<8x4xf32>
      %91 = math.exp %90 : vector<8x4xf32>
      %cst_71 = arith.constant dense<0.000000e+00> : vector<8xf32>
      %92 = vector.multi_reduction <add>, %91, %cst_71 [1] : vector<8x4xf32> to vector<8xf32>
      %93 = vector.shape_cast %92 : vector<8xf32> to vector<8x1xf32>
      %94 = vector.broadcast %93 : vector<8x1xf32> to vector<8x4xf32>
      %95 = arith.divf %91, %94 : vector<8x4xf32>
      %96 = vector.shape_cast %95 : vector<8x4xf32> to vector<8x1x4x1xf32>
      %97 = vector.broadcast %96 : vector<8x1x4x1xf32> to vector<8x2x4x8xf32>
      %98 = arith.mulf %97, %85 : vector<8x2x4x8xf32>
      %cst_72 = arith.constant dense<0.000000e+00> : vector<2x4x8xf32>
      %99 = vector.multi_reduction <add>, %98, %cst_72 [0] : vector<8x2x4x8xf32> to vector<2x4x8xf32>
      %100 = arith.mulf %99, %99 : vector<2x4x8xf32>
      %cst_73 = arith.constant dense<0.000000e+00> : vector<2x4xf32>
      %101 = vector.multi_reduction <add>, %100, %cst_73 [2] : vector<2x4x8xf32> to vector<2x4xf32>
      %102 = vector.shape_cast %101 : vector<2x4xf32> to vector<2x4x1xf32>
      %cst_74 = arith.constant 9.99999971E-10 : f32
      %103 = vector.broadcast %cst_74 : f32 to vector<2x4x1xf32>
      %104 = arith.addf %102, %103 : vector<2x4x1xf32>
      %105 = math.rsqrt %104 : vector<2x4x1xf32>
      %106 = arith.mulf %102, %105 : vector<2x4x1xf32>
      %cst_75 = arith.constant 1.000000e+00 : f32
      %107 = vector.broadcast %cst_75 : f32 to vector<2x4x1xf32>
      %108 = arith.addf %107, %102 : vector<2x4x1xf32>
      %109 = arith.divf %106, %108 : vector<2x4x1xf32>
      %110 = vector.broadcast %109 : vector<2x4x1xf32> to vector<2x4x8xf32>
      %111 = arith.mulf %99, %110 : vector<2x4x8xf32>
      %112 = vector.shape_cast %86 : vector<8x4xf32> to vector<8x1x4xf32>
      %113 = vector.shape_cast %111 : vector<2x4x8xf32> to vector<1x2x4x8xf32>
      %114 = vector.broadcast %113 : vector<1x2x4x8xf32> to vector<8x2x4x8xf32>
      %115 = arith.mulf %85, %114 : vector<8x2x4x8xf32>
      %cst_76 = arith.constant dense<0.000000e+00> : vector<8x2x4xf32>
      %116 = vector.multi_reduction <add>, %115, %cst_76 [3] : vector<8x2x4x8xf32> to vector<8x2x4xf32>
      %117 = vector.broadcast %112 : vector<8x1x4xf32> to vector<8x2x4xf32>
      %118 = arith.addf %117, %116 : vector<8x2x4xf32>
      %cst_77 = arith.constant dense<0xFF800000> : vector<8x2xf32>
      %119 = vector.multi_reduction <maximumf>, %118, %cst_77 [2] : vector<8x2x4xf32> to vector<8x2xf32>
      %120 = vector.shape_cast %119 : vector<8x2xf32> to vector<8x2x1xf32>
      %121 = vector.broadcast %120 : vector<8x2x1xf32> to vector<8x2x4xf32>
      %122 = arith.subf %118, %121 : vector<8x2x4xf32>
      %123 = math.exp %122 : vector<8x2x4xf32>
      %cst_78 = arith.constant dense<0.000000e+00> : vector<8x2xf32>
      %124 = vector.multi_reduction <add>, %123, %cst_78 [2] : vector<8x2x4xf32> to vector<8x2xf32>
      %125 = vector.shape_cast %124 : vector<8x2xf32> to vector<8x2x1xf32>
      %126 = vector.broadcast %125 : vector<8x2x1xf32> to vector<8x2x4xf32>
      %127 = arith.divf %123, %126 : vector<8x2x4xf32>
      %128 = vector.shape_cast %127 : vector<8x2x4xf32> to vector<8x2x4x1xf32>
      %129 = vector.broadcast %128 : vector<8x2x4x1xf32> to vector<8x2x4x8xf32>
      %130 = arith.mulf %129, %85 : vector<8x2x4x8xf32>
      %cst_79 = arith.constant dense<0.000000e+00> : vector<2x4x8xf32>
      %131 = vector.multi_reduction <add>, %130, %cst_79 [0] : vector<8x2x4x8xf32> to vector<2x4x8xf32>
      %132 = arith.mulf %131, %131 : vector<2x4x8xf32>
      %cst_80 = arith.constant dense<0.000000e+00> : vector<2x4xf32>
      %133 = vector.multi_reduction <add>, %132, %cst_80 [2] : vector<2x4x8xf32> to vector<2x4xf32>
      %134 = vector.shape_cast %133 : vector<2x4xf32> to vector<2x4x1xf32>
      %cst_81 = arith.constant 9.99999971E-10 : f32
      %135 = vector.broadcast %cst_81 : f32 to vector<2x4x1xf32>
      %136 = arith.addf %134, %135 : vector<2x4x1xf32>
      %137 = math.rsqrt %136 : vector<2x4x1xf32>
      %138 = arith.mulf %134, %137 : vector<2x4x1xf32>
      %cst_82 = arith.constant 1.000000e+00 : f32
      %139 = vector.broadcast %cst_82 : f32 to vector<2x4x1xf32>
      %140 = arith.addf %139, %134 : vector<2x4x1xf32>
      %141 = arith.divf %138, %140 : vector<2x4x1xf32>
      %142 = vector.broadcast %141 : vector<2x4x1xf32> to vector<2x4x8xf32>
      %143 = arith.mulf %131, %142 : vector<2x4x8xf32>
      %144 = vector.shape_cast %143 : vector<2x4x8xf32> to vector<1x2x4x8xf32>
      %145 = vector.broadcast %144 : vector<1x2x4x8xf32> to vector<8x2x4x8xf32>
      %146 = arith.mulf %85, %145 : vector<8x2x4x8xf32>
      %cst_83 = arith.constant dense<0.000000e+00> : vector<8x2x4xf32>
      %147 = vector.multi_reduction <add>, %146, %cst_83 [3] : vector<8x2x4x8xf32> to vector<8x2x4xf32>
      %148 = arith.addf %118, %147 : vector<8x2x4xf32>
      %cst_84 = arith.constant dense<0xFF800000> : vector<8x2xf32>
      %149 = vector.multi_reduction <maximumf>, %148, %cst_84 [2] : vector<8x2x4xf32> to vector<8x2xf32>
      %150 = vector.shape_cast %149 : vector<8x2xf32> to vector<8x2x1xf32>
      %151 = vector.broadcast %150 : vector<8x2x1xf32> to vector<8x2x4xf32>
      %152 = arith.subf %148, %151 : vector<8x2x4xf32>
      %153 = math.exp %152 : vector<8x2x4xf32>
      %cst_85 = arith.constant dense<0.000000e+00> : vector<8x2xf32>
      %154 = vector.multi_reduction <add>, %153, %cst_85 [2] : vector<8x2x4xf32> to vector<8x2xf32>
      %155 = vector.shape_cast %154 : vector<8x2xf32> to vector<8x2x1xf32>
      %156 = vector.broadcast %155 : vector<8x2x1xf32> to vector<8x2x4xf32>
      %157 = arith.divf %153, %156 : vector<8x2x4xf32>
      %158 = vector.shape_cast %157 : vector<8x2x4xf32> to vector<8x2x4x1xf32>
      %159 = vector.broadcast %158 : vector<8x2x4x1xf32> to vector<8x2x4x8xf32>
      %160 = arith.mulf %159, %85 : vector<8x2x4x8xf32>
      %cst_86 = arith.constant dense<0.000000e+00> : vector<2x4x8xf32>
      %161 = vector.multi_reduction <add>, %160, %cst_86 [0] : vector<8x2x4x8xf32> to vector<2x4x8xf32>
      %162 = arith.mulf %161, %161 : vector<2x4x8xf32>
      %cst_87 = arith.constant dense<0.000000e+00> : vector<2x4xf32>
      %163 = vector.multi_reduction <add>, %162, %cst_87 [2] : vector<2x4x8xf32> to vector<2x4xf32>
      %164 = vector.shape_cast %163 : vector<2x4xf32> to vector<2x4x1xf32>
      %cst_88 = arith.constant 9.99999971E-10 : f32
      %165 = vector.broadcast %cst_88 : f32 to vector<2x4x1xf32>
      %166 = arith.addf %164, %165 : vector<2x4x1xf32>
      %167 = math.rsqrt %166 : vector<2x4x1xf32>
      %168 = arith.mulf %164, %167 : vector<2x4x1xf32>
      %cst_89 = arith.constant 1.000000e+00 : f32
      %169 = vector.broadcast %cst_89 : f32 to vector<2x4x1xf32>
      %170 = arith.addf %169, %164 : vector<2x4x1xf32>
      %171 = arith.divf %168, %170 : vector<2x4x1xf32>
      %172 = vector.broadcast %171 : vector<2x4x1xf32> to vector<2x4x8xf32>
      %173 = arith.mulf %161, %172 : vector<2x4x8xf32>
      %174 = vector.shape_cast %173 : vector<2x4x8xf32> to vector<1x2x4x8xf32>
      %175 = vector.broadcast %174 : vector<1x2x4x8xf32> to vector<8x2x4x8xf32>
      %176 = arith.mulf %85, %175 : vector<8x2x4x8xf32>
      %cst_90 = arith.constant dense<0.000000e+00> : vector<8x2x4xf32>
      %177 = vector.multi_reduction <add>, %176, %cst_90 [3] : vector<8x2x4x8xf32> to vector<8x2x4xf32>
      %178 = arith.addf %148, %177 : vector<8x2x4xf32>
      %cst_91 = arith.constant dense<0xFF800000> : vector<8x2xf32>
      %179 = vector.multi_reduction <maximumf>, %178, %cst_91 [2] : vector<8x2x4xf32> to vector<8x2xf32>
      %180 = vector.shape_cast %179 : vector<8x2xf32> to vector<8x2x1xf32>
      %181 = vector.broadcast %180 : vector<8x2x1xf32> to vector<8x2x4xf32>
      %182 = arith.subf %178, %181 : vector<8x2x4xf32>
      %183 = math.exp %182 : vector<8x2x4xf32>
      %cst_92 = arith.constant dense<0.000000e+00> : vector<8x2xf32>
      %184 = vector.multi_reduction <add>, %183, %cst_92 [2] : vector<8x2x4xf32> to vector<8x2xf32>
      %185 = vector.shape_cast %184 : vector<8x2xf32> to vector<8x2x1xf32>
      %186 = vector.broadcast %185 : vector<8x2x1xf32> to vector<8x2x4xf32>
      %187 = arith.divf %183, %186 : vector<8x2x4xf32>
      %188 = vector.shape_cast %187 : vector<8x2x4xf32> to vector<8x2x4x1xf32>
      %189 = vector.broadcast %188 : vector<8x2x4x1xf32> to vector<8x2x4x8xf32>
      %190 = arith.mulf %189, %85 : vector<8x2x4x8xf32>
      %cst_93 = arith.constant dense<0.000000e+00> : vector<2x4x8xf32>
      %191 = vector.multi_reduction <add>, %190, %cst_93 [0] : vector<8x2x4x8xf32> to vector<2x4x8xf32>
      %192 = arith.mulf %191, %191 : vector<2x4x8xf32>
      %cst_94 = arith.constant dense<0.000000e+00> : vector<2x4xf32>
      %193 = vector.multi_reduction <add>, %192, %cst_94 [2] : vector<2x4x8xf32> to vector<2x4xf32>
      %194 = vector.shape_cast %193 : vector<2x4xf32> to vector<2x4x1xf32>
      %cst_95 = arith.constant 9.99999971E-10 : f32
      %195 = vector.broadcast %cst_95 : f32 to vector<2x4x1xf32>
      %196 = arith.addf %194, %195 : vector<2x4x1xf32>
      %197 = math.rsqrt %196 : vector<2x4x1xf32>
      %198 = arith.mulf %194, %197 : vector<2x4x1xf32>
      %cst_96 = arith.constant 1.000000e+00 : f32
      %199 = vector.broadcast %cst_96 : f32 to vector<2x4x1xf32>
      %200 = arith.addf %199, %194 : vector<2x4x1xf32>
      %201 = arith.divf %198, %200 : vector<2x4x1xf32>
      %202 = vector.broadcast %201 : vector<2x4x1xf32> to vector<2x4x8xf32>
      %203 = arith.mulf %191, %202 : vector<2x4x8xf32>
      %c0_97 = arith.constant 0 : index
      %c0_98 = arith.constant 0 : index
      %c0_99 = arith.constant 0 : index
      %204 = vector.load %arg5[%c0_97, %c0_98, %c0_99] : memref<2x4x8xf32, #tpu.memory_space<vmem>>, vector<2x4x8xf32>
      tpu.vector_store %arg5[%c0_97, %c0_98, %c0_99], %203 {strides = array<i32>} : memref<2x4x8xf32, #tpu.memory_space<vmem>>, vector<2x4x8xf32>,
    } else {
    }
    return
  }
  func.func @transform_0(%arg0: i32, %arg1: i32) -> (i32, i32, i32) {
    %c0_i32 = arith.constant 0 : i32
    %c0_i32_0 = arith.constant 0 : i32
    return %arg0, %arg1, %c0_i32 : i32, i32, i32
  }
  func.func @transform_1(%arg0: i32, %arg1: i32) -> (i32, i32, i32) {
    %c0_i32 = arith.constant 0 : i32
    %c0_i32_0 = arith.constant 0 : i32
    %c0_i32_1 = arith.constant 0 : i32
    return %arg1, %c0_i32, %c0_i32_0 : i32, i32, i32
  }
  func.func @transform_2(%arg0: i32, %arg1: i32) -> (i32, i32) {
    %c0_i32 = arith.constant 0 : i32
    %c0_i32_0 = arith.constant 0 : i32
    %c0_i32_1 = arith.constant 0 : i32
    return %c0_i32, %c0_i32_0 : i32, i32
  }
  func.func @transform_3(%arg0: i32, %arg1: i32) -> (i32, i32, i32) {
    %c0_i32 = arith.constant 0 : i32
    %c0_i32_0 = arith.constant 0 : i32
    %c0_i32_1 = arith.constant 0 : i32
    return %arg0, %c0_i32, %c0_i32_0 : i32, i32, i32
  }
}

</mosaic_0001>

<bundles_post_ra>
// kernel: tpu_custom_call.1
= control target key start
LH: loop header
LB: loop body
LE: loop exit
PB: predicated region body
PF: predicated region fallthrough
CT: control target
= control target key end

     0   :  { %8 = vsyncpa [#allocation4], 0  ;;  %s3627_s0 = inlined_call_operand.hbm [shape: f32[2,8,16], index: 0, kind: input, shape index: {}]   ;;  %s3628_s1 = inlined_call_operand.hbm [shape: f32[8,16,32], index: 1, kind: input, shape index: {}]   ;;  %s3629_s2 = inlined_call_operand.vmem [shape: f32[8,4], index: 2, kind: input, shape index: {}]   ;;  %s3630_s3 = inlined_call_operand.hbm [shape: f32[2,4,8], index: 3, kind: output, shape index: {}]  }
   0x1   :  { %9 = vsyncpa [#allocation7], 0 }
   0x2   :  { %10 = vsyncpa [#allocation5], 0  ;;  %s2885_s12 = smov [#allocation3]  }
   0x3   :  { %s16_s13 = sshll.u32 %s2885_s12, 4  ;;  %s17_s13 = int_to_ptr.vmem [resolvable:$true] %s16_s13 }
   0x4   :  { %s2827_s14 = scalar_lea.vmem %s17_s13, 256  ;;  %p2832_p1 = scmp.lt.s32.totalorder %s17_s13, %s17_s13 }
   0x5   :  { %p2828_p0 = scmp.ne.s32.totalorder %s17_s13, %s2827_s14  ;;  %p2833_p2 = scmp.lt.s32.totalorder %s2827_s14, %s2827_s14 }
   0x7   :  { %p2834_p3 = por %p2833_p2, %p2832_p1 }
   0x9   :  { %p2835_p4 = pnand %p2834_p3, %p2828_p0 }
   0xb   :  { %2838 = shalt.err (!%p2835_p4)
}
   0xc   :  { %s2886_s15 = smov 128   ;;  %s2887_s16 = smov 8  }
   0xd   :  { %22 = dma.hbm_to_vmem [thread:$0]  %s3627_s0, 256, %s17_s13, [#allocation4], %s2886_s15, %s2886_s15, %s2887_s16  }
   0xe   :  { %s2888_s19 = smov [#allocation6]  }
   0xf   :  { %s28_s20 = sshll.u32 %s2888_s19, 4  ;;  %s29_s20 = int_to_ptr.vmem [resolvable:$true] %s28_s20 }
  0x10   :  { %s2847_s21 = scalar_lea.vmem %s29_s20, 2048  ;;  %p2852_p6 = scmp.lt.s32.totalorder %s29_s20, %s29_s20 }
  0x11   :  { %p2848_p5 = scmp.ne.s32.totalorder %s29_s20, %s2847_s21  ;;  %p2853_p7 = scmp.lt.s32.totalorder %s2847_s21, %s2847_s21 }
  0x13   :  { %p2854_p8 = por %p2853_p7, %p2852_p6 }
  0x15   :  { %p2855_p9 = pnand %p2854_p8, %p2848_p5 }
  0x17   :  { %2858 = shalt.err (!%p2855_p9)
}
  0x18   :  { %34 = dma.hbm_to_vmem [thread:$0]  %s3628_s1, 2048, %s29_s20, [#allocation7], %s2886_s15, %s2886_s15, %s2887_s16  }
  0x19   :  { %2879 = dma.done.wait [#allocation4], 256  }
  0x1a   :  { %2880 = vsyncadd [#allocation4], 4294967040 }
  0x1b   :  { %2881 = dma.done.wait [#allocation7], 2048  }
  0x1c   :  { %2882 = vsyncadd [#allocation7], 4294965248  ;;  %v2889_v0 = vmov 0.0   ;;  %vm2890_vm0 = vmmov 0   ;;  %vm1018_vm1 = vcmask 31744   ;;  %v47_v1 = vld [vmem:[#allocation6 + $0x8] sm:$0xff] }
  0x1d   :  { %2615 = vmatprep.subr.mxu0 %v2889_v0  ;;  %2622 = vmatprep.subr.mxu1 %v2889_v0  ;;  %v134_v2 = vld [vmem:[#allocation6 + $0x18] sm:$0xff]  ;;  %v2935_v3 = vld [vmem:[%s3629_s2] sm:$0xff]  ;;  %v133_v6 = vld [vmem:[#allocation6 + $0x10] sm:$0xff]  ;;  %vm51_vm2 = vcmask 1041409   ;;  %vm53_vm3 = vcmask 130048   ;;  %vm128_vm4 = vcmask 254976  }
  0x1e   :  { %2619 = vmatprep.mubr.msk.f32.mxu0 %vm2890_vm0, %v2889_v0  ;;  %2626 = vmatprep.mubr.msk.f32.mxu1 %vm2890_vm0, %v2889_v0  ;;  %v1019_v4 = vsel %vm1018_vm1, %v2935_v3, -inf  ;;  %v46_v5 = vld [vmem:[#allocation6] sm:$0xff]  ;;  %v44_v7 = vld [vmem:[#allocation3] sm:$0x1]  ;;  %v45_v8 = vld [vmem:[#allocation3 + $0x8] sm:$0x1] }
  0x1f   :  { %2616 = vmatpush3.msra.mxu0 %v47_v1  ;;  %2623 = vmatpush3.msra.mxu1 %v134_v2  ;;  %v130_v9 = vld [vmem:[#allocation3 + $0x1] sm:$0x1]  ;;  %v131_v10 = vld [vmem:[#allocation3 + $0x9] sm:$0x1]  ;;  %v50_v11 = vrot.slane %v45_v8, 7  ;;  %v219_v19 = vld [vmem:[#allocation6 + $0x28] sm:$0xff] }
  0x20   :  { %1020 = vmax.xlane.f32.xlu0 %v1019_v4  ;;  %2617 = vmatprep.subr.mxu0 %v2889_v0  ;;  %v137_v12 = vrot.slane %v131_v10, 7  ;;  %v304_v13 = vld [vmem:[#allocation6 + $0x38] sm:$0xff]  ;;  %v300_v14 = vld [vmem:[#allocation3 + $0x3] sm:$0x1]  ;;  %v215_v22 = vld [vmem:[#allocation3 + $0x2] sm:$0x1] }
  0x21   :  { %2624 = vmatprep.subr.mxu1 %v2889_v0  ;;  %2618 = vmatpush3.msra.mxu0 %v46_v5  ;;  %v301_v15 = vld [vmem:[#allocation3 + $0xb] sm:$0x1]  ;;  %v52_v16 = vsel %vm51_vm2, %v50_v11, %v44_v7  ;;  %v216_v20 = vld [vmem:[#allocation3 + $0xa] sm:$0x1]  ;;  %v303_v21 = vld [vmem:[#allocation6 + $0x30] sm:$0xff]  ;;  %s2891_s2 = smov 112  }
  0x22   :  { %2625 = vmatpush3.msra.mxu1 %v133_v6  ;;  %2629 = vmatprep.subr.mxu0 %v2889_v0  ;;  %v138_v17 = vsel %vm51_vm2, %v137_v12, %v130_v9  ;;  %v307_v18 = vrot.slane %v301_v15, 7  ;;  %v222_v23 = vrot.slane %v216_v20, 7  ;;  %v386_v24 = vld [vmem:[#allocation3 + $0xc] sm:$0x1]  ;;  %v218_v26 = vld [vmem:[#allocation6 + $0x20] sm:$0xff]  ;;  %v389_v30 = vld [vmem:[#allocation6 + $0x48] sm:$0xff] }
  0x23   :  { %2636 = vmatprep.subr.mxu1 %v2889_v0  ;;  %2620 = vmatmul.mubr.msk.f32.vlgmr.msra.gmra.mxu0 %vm53_vm3, %v52_v16  ;;  %v471_v27 = vld [vmem:[#allocation3 + $0xd] sm:$0x1]  ;;  %v392_v29 = vrot.slane %v386_v24, 7  ;;  %v385_v31 = vld [vmem:[#allocation3 + $0x4] sm:$0x1]  ;;  %v388_v35 = vld [vmem:[#allocation6 + $0x40] sm:$0xff] }
  0x24   :  { %2627 = vmatmul.mubr.msk.f32.vlgmr.msra.gmra.mxu1 %vm53_vm3, %v138_v17  ;;  %v308_v25 = vsel %vm51_vm2, %v307_v18, %v300_v14  ;;  %2630 = vmatpush3.msra.mxu0 %v219_v19  ;;  %v223_v28 = vsel %vm51_vm2, %v222_v23, %v215_v22  ;;  %v474_v32 = vld [vmem:[#allocation6 + $0x58] sm:$0xff]  ;;  %v477_v33 = vrot.slane %v471_v27, 7  ;;  %v470_v36 = vld [vmem:[#allocation3 + $0x5] sm:$0x1]  ;;  %v559_v42 = vld [vmem:[#allocation6 + $0x68] sm:$0xff]  ;;  %s2892_s24 = smov 120   ;;  %v821_v19 = vlaneseq }
  0x25   :  { %2637 = vmatpush3.msra.mxu1 %v304_v13  ;;  %2640 = vmatprep.mubr.msk.f32.mxu1 %vm2890_vm0, %v2889_v0  ;;  %v556_v34 = vld [vmem:[#allocation3 + $0xe] sm:$0x1]  ;;  %v393_v37 = vsel %vm51_vm2, %v392_v29, %v385_v31  ;;  %v473_v38 = vld [vmem:[#allocation6 + $0x50] sm:$0xff]  ;;  %v641_v40 = vld [vmem:[#allocation3 + $0xf] sm:$0x1]  ;;  %s2893_s25 = smov 104  }
  0x26   :  { %2638 = vmatprep.subr.mxu1 %v2889_v0  ;;  %2631 = vmatprep.subr.mxu0 %v2889_v0  ;;  %v562_v39 = vrot.slane %v556_v34, 7  ;;  %v478_v41 = vsel %vm51_vm2, %v477_v33, %v470_v36  ;;  %v555_v43 = vld [vmem:[#allocation3 + $0x6] sm:$0x1]  ;;  %v558_v44 = vld [vmem:[#allocation6 + $0x60] sm:$0xff]  ;;  %v647_v45 = vrot.slane %v641_v40, 7  ;;  %v644_v47 = vld [vmem:[#allocation6 + $0x78] sm:$0xff] }
  0x27   :  { %2639 = vmatpush3.msra.mxu1 %v303_v21  ;;  %2632 = vmatpush3.msra.mxu0 %v218_v26  ;;  %v640_v48 = vld [vmem:[#allocation3 + $0x7] sm:$0x1]  ;;  %v3051_v20 = vshrl.u32 %v821_v19, 7  ;;  %vm1102_vm5 = vcmask 60416   ;;  %vm1415_vm6 = vcmask 25600   ;;  %s2897_s26 = smov [#allocation8]  }
  0x28   :  { %2641 = vmatmul.mubr.msk.f32.vlgmr.msra.gmra.mxu1 %vm53_vm3, %v308_v25  ;;  %2633 = vmatprep.mubr.msk.f32.mxu0 %vm2890_vm0, %v2889_v0  ;;  %v563_v46 = vsel %vm51_vm2, %v562_v39, %v555_v43  ;;  %v643_v49 = vld [vmem:[#allocation6 + $0x70] sm:$0xff]  ;;  %v648_v50 = vsel %vm51_vm2, %v647_v45, %v640_v48  ;;  %s2563_s27 = sshll.u32 %s2897_s26, 4  ;;  %s2564_s27 = int_to_ptr.vmem [resolvable:$true] %s2563_s27 }
  0x29   :  { %2643 = vmatprep.subr.mxu0 %v2889_v0  ;;  %2634 = vmatmul.mubr.msk.f32.vlgmr.msra.gmra.mxu0 %vm53_vm3, %v223_v28  ;;  %v3054_v21 = vsub.s32 0, %v3051_v20  ;;  %v3057_v22 = vsub.s32 1, %v3051_v20  ;;  %v1053_v27 = vsub.s32 3, %v3051_v20  ;;  %v1046_v28 = vsub.s32 2, %v3051_v20  ;;  %s2859_s28 = scalar_lea.vmem %s2564_s27, 128  ;;  %p2864_p11 = scmp.lt.s32.totalorder %s2564_s27, %s2564_s27 }
  0x2a   :  { %2650 = vmatprep.subr.mxu1 %v2889_v0  ;;  %2644 = vmatpush3.msra.mxu0 %v389_v30  ;;  %v1067_v31 = vsub.s32 5, %v3051_v20  ;;  %v1074_v36 = vsub.s32 6, %v3051_v20  ;;  %p2860_p10 = scmp.ne.s32.totalorder %s2564_s27, %s2859_s28  ;;  %p2865_p12 = scmp.lt.s32.totalorder %s2859_s28, %s2859_s28 }
  0x2b   :  { %2647 = vmatprep.mubr.msk.f32.mxu0 %vm2890_vm0, %v2889_v0  ;;  %2645 = vmatprep.subr.mxu0 %v2889_v0 }
  0x2c   :  { %2651 = vmatpush3.msra.mxu1 %v474_v32  ;;  %2646 = vmatpush3.msra.mxu0 %v388_v35  ;;  %v1060_v32 = vsub.s32 4, %v3051_v20  ;;  %v1081_v35 = vsub.s32 7, %v3051_v20  ;;  %p2866_p13 = por %p2865_p12, %p2864_p11 }
  0x2d   :  { %2652 = vmatprep.subr.mxu1 %v2889_v0  ;;  %2648 = vmatmul.mubr.msk.f32.vlgmr.msra.gmra.mxu0 %vm53_vm3, %v393_v37 }
  0x2e   :  { %2653 = vmatpush3.msra.mxu1 %v473_v38  ;;  %2654 = vmatprep.mubr.msk.f32.mxu1 %vm2890_vm0, %v2889_v0  ;;  %p2867_p0 = pnand %p2866_p13, %p2860_p10 }
  0x2f   :  { %2657 = vmatprep.subr.mxu0 %v2889_v0  ;;  %2655 = vmatmul.mubr.msk.f32.vlgmr.msra.gmra.mxu1 %vm53_vm3, %v478_v41 }
  0x30   :  { %2658 = vmatpush3.msra.mxu0 %v559_v42  ;;  %2661 = vmatprep.mubr.msk.f32.mxu0 %vm2890_vm0, %v2889_v0 }
  0x31   :  { %2659 = vmatprep.subr.mxu0 %v2889_v0  ;;  %2664 = vmatprep.subr.mxu1 %v2889_v0 }
  0x32   :  { %2660 = vmatpush3.msra.mxu0 %v558_v44  ;;  %2665 = vmatpush3.msra.mxu1 %v644_v47 }
  0x33   :  { %2662 = vmatmul.mubr.msk.f32.vlgmr.msra.gmra.mxu0 %vm53_vm3, %v563_v46  ;;  %2666 = vmatprep.subr.mxu1 %v2889_v0 }
  0x34   :  { %2668 = vmatprep.mubr.msk.f32.mxu1 %vm2890_vm0, %v2889_v0  ;;  %2667 = vmatpush3.msra.mxu1 %v643_v49 }
  0x35   :  { %2669 = vmatmul.mubr.msk.f32.vlgmr.msra.gmra.mxu1 %vm53_vm3, %v648_v50 }
  0xa9   :  { %v1021_v51 = vpop.xlane.xlu0 %1020 }
  0xaa   :  { %v1022_v52 = vsub.f32 %v2935_v3, %v1021_v51 }
  0xac   :  { %v1023_v53 = vmul.f32 1.442695, %v1022_v52 }
  0xae   :  { %2687 = vpow2.f32 %v1023_v53 }
  0xbb   :  { %v2982_v54 = vpop.eup %2687 }
  0xbc   :  { %v1025_v55 = vsel %vm1018_vm1, %v2982_v54, 0.0 }
  0xbd   :  { %1026 = vadd.xlane.f32.xlu0 %v1025_v55 }
  0xe3   :  { %v122_v56 = vpop.f32.mrf.mxu0 }
  0xe4   :  { %v207_v57 = vpop.f32.mrf.mxu1  ;;  %129 = vst.msk [vmem:[#allocation2] sm:$0x3] %vm128_vm4, %v122_v56 }
  0xe5   :  { %214 = vst.msk [vmem:[#allocation2 + $0x2] sm:$0x3] %vm128_vm4, %v207_v57  ;;  %v2621_v59 = vpop.f32.mrf.mxu0  ;;  %v2894_v57 = vmov 1983009808  }
  0xe6   :  { %v2628_v58 = vpop.f32.mrf.mxu1 }
  0xe7   :  { %v819_v58 = vunpack.c.l.s4 %v2894_v57 }
  0xe8   :  { %v377_v60 = vpop.f32.mrf.mxu1 }
  0xe9   :  { %384 = vst.msk [vmem:[#allocation2 + $0x6] sm:$0x3] %vm128_vm4, %v377_v60  ;;  %v292_v61 = vpop.f32.mrf.mxu0 }
  0xea   :  { %v2642_v62 = vpop.f32.mrf.mxu1  ;;  %299 = vst.msk [vmem:[#allocation2 + $0x4] sm:$0x3] %vm128_vm4, %v292_v61  ;;  %v820_v61 = vunpack.c.0.s8 %v819_v58 }
  0xeb   :  { %v2990_v63 = vld [vmem:[#allocation2] sm:$0x3]  ;;  %v2635_v1 = vpop.f32.mrf.mxu0  ;;  %v2895_v62 = vmov 1934713408  }
  0xec   :  { %769 = vrot.lane.b32.xlu0 %v2990_v63, %s2891_s2  ;;  %745 = vrot.lane.b32.xlu1 %v2990_v63, %s2892_s24  ;;  %v2996_v4 = vld [vmem:[#allocation2 + $0x2] sm:$0x3]  ;;  %v835_v1 = vunpack.c.l.s4 %v2895_v62 }
  0xed   :  { %v462_v2 = vpop.f32.mrf.mxu0 }
  0xee   :  { %469 = vst.msk [vmem:[#allocation2 + $0x8] sm:$0x3] %vm128_vm4, %v462_v2 }
  0xef   :  { %v547_v6 = vpop.f32.mrf.mxu1  ;;  %v2649_v7 = vpop.f32.mrf.mxu0 }
  0xf0   :  { %v2999_v5 = vld [vmem:[#allocation2 + $0x6] sm:$0x3]  ;;  %747 = vrot.lane.b32.xlu1 %v2996_v4, %s2892_s24  ;;  %554 = vst.msk [vmem:[#allocation2 + $0xa] sm:$0x3] %vm128_vm4, %v547_v6 }
  0xf1   :  { %751 = vrot.lane.b32.xlu0 %v2999_v5, %s2892_s24  ;;  %v2656_v8 = vpop.f32.mrf.mxu1  ;;  %v3021_v15 = vld [vmem:[#allocation2 + $0x4] sm:$0x3] }
  0xf3   :  { %v632_v9 = vpop.f32.mrf.mxu0 }
  0xf4   :  { %639 = vst.msk [vmem:[#allocation2 + $0xc] sm:$0x3] %vm128_vm4, %v632_v9  ;;  %771 = vrot.lane.b32.xlu1 %v2996_v4, %s2891_s2 }
  0xf5   :  { %799 = vrot.lane.b32.xlu0 %v2999_v5, %s2893_s25  ;;  %v2663_v10 = vpop.f32.mrf.mxu0  ;;  %v3010_v11 = vld [vmem:[#allocation2 + $0x8] sm:$0x3]  ;;  %v717_v12 = vpop.f32.mrf.mxu1 }
  0xf6   :  { %724 = vst.msk [vmem:[#allocation2 + $0xe] sm:$0x3] %vm128_vm4, %v717_v12  ;;  %v823_v12 = vsub.s32 %v820_v61, %v3051_v20 }
  0xf7   :  { %v2670_v13 = vpop.f32.mrf.mxu1  ;;  %v3016_v14 = vld [vmem:[#allocation2 + $0xa] sm:$0x3] }
  0xf8   :  { %793 = vrot.lane.b32.xlu1 %v2990_v63, %s2893_s25 }
  0xf9   :  { %777 = vrot.lane.b32.xlu0 %v3010_v11, %s2891_s2 }
  0xfb   :  { %v3026_v16 = vld [vmem:[#allocation2 + $0xc] sm:$0x3] }
  0xfc   :  { %795 = vrot.lane.b32.xlu1 %v2996_v4, %s2893_s25 }
  0xfd   :  { %755 = vrot.lane.b32.xlu0 %v3016_v14, %s2892_s24  ;;  %v3032_v17 = vld [vmem:[#allocation2 + $0xe] sm:$0x3] }
 0x100   :  { %749 = vrot.lane.b32.xlu1 %v3021_v15, %s2892_s24 }
 0x101   :  { %803 = vrot.lane.b32.xlu0 %v3016_v14, %s2893_s25 }
 0x104   :  { %773 = vrot.lane.b32.xlu1 %v3021_v15, %s2891_s2 }
 0x105   :  { %781 = vrot.lane.b32.xlu0 %v3026_v16, %s2891_s2 }
 0x108   :  { %797 = vrot.lane.b32.xlu1 %v3021_v15, %s2893_s25 }
 0x109   :  { %759 = vrot.lane.b32.xlu0 %v3032_v17, %s2892_s24 }
 0x10c   :  { %775 = vrot.lane.b32.xlu1 %v2999_v5, %s2891_s2 }
 0x10d   :  { %807 = vrot.lane.b32.xlu0 %v3032_v17, %s2893_s25 }
 0x110   :  { %753 = vrot.lane.b32.xlu1 %v3010_v11, %s2892_s24 }
 0x114   :  { %801 = vrot.lane.b32.xlu1 %v3010_v11, %s2893_s25 }
 0x118   :  { %779 = vrot.lane.b32.xlu1 %v3016_v14, %s2891_s2 }
 0x11c   :  { %757 = vrot.lane.b32.xlu1 %v3026_v16, %s2892_s24 }
 0x120   :  { %805 = vrot.lane.b32.xlu1 %v3026_v16, %s2893_s25 }
 0x124   :  { %783 = vrot.lane.b32.xlu1 %v3032_v17, %s2891_s2 }
 0x146   :  { %v1027_v18 = vpop.xlane.xlu0 %1026 }
 0x147   :  { %2689 = vrcp.f32 %v1027_v18 }
 0x154   :  { %v2690_v23 = vpop.eup %2689 }
 0x155   :  { %v1029_v24 = vmul.f32 %v2690_v23, %v2982_v54 }
 0x157   :  { %v1033_v25 = vrot.slane %v1029_v24, %v3054_v21  ;;  %v1040_v26 = vrot.slane %v1029_v24, %v3057_v22  ;;  %v1054_v29 = vrot.slane %v1029_v24, %v1053_v27  ;;  %v1047_v30 = vrot.slane %v1029_v24, %v1046_v28 }
 0x158   :  { %v1068_v33 = vrot.slane %v1029_v24, %v1067_v31  ;;  %v1061_v34 = vrot.slane %v1029_v24, %v1060_v32  ;;  %v1082_v37 = vrot.slane %v1029_v24, %v1081_v35  ;;  %v1075_v38 = vrot.slane %v1029_v24, %v1074_v36 }
 0x159   :  { %1035 = vbcast.lane.b32.xlu0 %v1033_v25, 256  ;;  %1042 = vbcast.lane.b32.xlu1 %v1040_v26, 256  ;;  %v836_v25 = vunpack.c.0.s8 %v835_v1 }
 0x15d   :  { %1056 = vbcast.lane.b32.xlu0 %v1054_v29, 256  ;;  %1049 = vbcast.lane.b32.xlu1 %v1047_v30, 256 }
 0x15e   :  { %v746_v39 = vpop.permute.xlu1 %745  ;;  %v770_v46 = vpop.permute.xlu0 %769 }
 0x15f   :  { %v817_v13 = vcombine.low %v2990_v63, %v770_v46  ;;  %v839_v63 = vsub.s32 %v836_v25, %v3051_v20 }
 0x161   :  { %1070 = vbcast.lane.b32.xlu0 %v1068_v33, 256  ;;  %1063 = vbcast.lane.b32.xlu1 %v1061_v34, 256  ;;  %v824_v31 = vrot.slane %v817_v13, %v823_v12 }
 0x162   :  { %v748_v40 = vpop.permute.xlu1 %747 }
 0x163   :  { %v752_v48 = vpop.permute.xlu0 %751 }
 0x165   :  { %1084 = vbcast.lane.b32.xlu0 %v1082_v37, 256  ;;  %1077 = vbcast.lane.b32.xlu1 %v1075_v38, 256 }
 0x166   :  { %v772_v41 = vpop.permute.xlu1 %771 }
 0x167   :  { %v800_v50 = vpop.permute.xlu0 %799  ;;  %v842_v18 = vcombine.low %v2996_v4, %v772_v41 }
 0x168   :  { %v900_v7 = vcombine.low %v752_v48, %v800_v50 }
 0x169   :  { %v849_v32 = vrot.slane %v842_v18, %v823_v12 }
 0x16a   :  { %v794_v42 = vpop.permute.xlu1 %793  ;;  %v907_v28 = vrot.slane %v900_v7, %v823_v12 }
 0x16b   :  { %v778_v52 = vpop.permute.xlu0 %777  ;;  %v825_v2 = vcombine.low %v746_v39, %v794_v42 }
 0x16d   :  { %v832_v26 = vrot.slane %v825_v2, %v823_v12 }
 0x16e   :  { %v796_v43 = vpop.permute.xlu1 %795 }
 0x16f   :  { %v756_v54 = vpop.permute.xlu0 %755  ;;  %v850_v6 = vcombine.low %v748_v40, %v796_v43  ;;  %v833_v4 = vcombine.low %v824_v31, %v832_v26 }
 0x171   :  { %v857_v27 = vrot.slane %v850_v6, %v823_v12 }
 0x172   :  { %v750_v44 = vpop.permute.xlu1 %749 }
 0x173   :  { %v804_v56 = vpop.permute.xlu0 %803  ;;  %v858_v37 = vcombine.low %v849_v32, %v857_v27 }
 0x174   :  { %v950_v33 = vcombine.low %v756_v54, %v804_v56 }
 0x176   :  { %v774_v45 = vpop.permute.xlu1 %773  ;;  %v957_v41 = vrot.slane %v950_v33, %v823_v12 }
 0x177   :  { %v782_v60 = vpop.permute.xlu0 %781  ;;  %v867_v24 = vcombine.low %v3021_v15, %v774_v45  ;;  %v917_v15 = vcombine.low %v3010_v11, %v778_v52 }
 0x179   :  { %v924_v48 = vrot.slane %v917_v15, %v823_v12 }
 0x17a   :  { %v798_v47 = vpop.permute.xlu1 %797 }
 0x17b   :  { %v875_v8 = vcombine.low %v750_v44, %v798_v47  ;;  %v760_v10 = vpop.permute.xlu0 %759  ;;  %v3077_v47 = vrot.slane %v833_v4, %v839_v63 }
 0x17d   :  { %v882_v29 = vrot.slane %v875_v8, %v823_v12  ;;  %v3088_v56 = vcombine.high %v3077_v47, %v2889_v0 }
 0x17e   :  { %v776_v49 = vpop.permute.xlu1 %775 }
 0x17f   :  { %v892_v9 = vcombine.low %v2999_v5, %v776_v49  ;;  %v874_v5 = vrot.slane %v867_v24, %v823_v12  ;;  %v808_v36 = vpop.permute.xlu0 %807  ;;  %v967_v49 = vcombine.low %v3026_v16, %v782_v60 }
 0x180   :  { %v1000_v42 = vcombine.low %v760_v10, %v808_v36 }
 0x181   :  { %v899_v30 = vrot.slane %v892_v9, %v823_v12  ;;  %v883_v39 = vcombine.low %v874_v5, %v882_v29  ;;  %v974_v57 = vrot.slane %v967_v49, %v823_v12 }
 0x182   :  { %v754_v51 = vpop.permute.xlu1 %753  ;;  %v1007_v11 = vrot.slane %v1000_v42, %v823_v12 }
 0x183   :  { %v908_v40 = vcombine.low %v899_v30, %v907_v28  ;;  %v3082_v50 = vrot.slane %v883_v39, %v839_v63 }
 0x185   :  { %v3100_v60 = vcombine.high %v3082_v50, %v2889_v0 }
 0x186   :  { %v802_v53 = vpop.permute.xlu1 %801 }
 0x187   :  { %v925_v34 = vcombine.low %v754_v51, %v802_v53  ;;  %v3084_v51 = vrot.slane %v908_v40, %v839_v63 }
 0x189   :  { %v932_v43 = vrot.slane %v925_v34, %v823_v12 }
 0x18a   :  { %v780_v55 = vpop.permute.xlu1 %779 }
 0x18b   :  { %v942_v35 = vcombine.low %v3016_v14, %v780_v55  ;;  %v3079_v14 = vrot.slane %v858_v37, %v839_v63  ;;  %v933_v52 = vcombine.low %v924_v48, %v932_v43 }
 0x18d   :  { %v949_v44 = vrot.slane %v942_v35, %v823_v12  ;;  %v3106_v6 = vrot.slane %v933_v52, %v839_v63 }
 0x18e   :  { %v758_v59 = vpop.permute.xlu1 %757 }
 0x18f   :  { %v958_v53 = vcombine.low %v949_v44, %v957_v41  ;;  %v3124_v32 = vcombine.high %v3106_v6, %v2889_v0 }
 0x191   :  { %v3108_v7 = vrot.slane %v958_v53, %v839_v63 }
 0x192   :  { %v806_v23 = vpop.permute.xlu1 %805 }
 0x193   :  { %v975_v45 = vcombine.low %v758_v59, %v806_v23  ;;  %v3096_v59 = vcombine.high %v3084_v51, %v2889_v0  ;;  %v3120_v31 = vcombine.high %v3108_v7, %v2889_v0 }
 0x195   :  { %v982_v54 = vrot.slane %v975_v45, %v823_v12 }
 0x196   :  { %v784_v38 = vpop.permute.xlu1 %783 }
 0x197   :  { %v992_v46 = vcombine.low %v3032_v17, %v784_v38  ;;  %v3092_v17 = vcombine.high %v3079_v14, %v2889_v0  ;;  %v983_v8 = vcombine.low %v974_v57, %v982_v54 }
 0x199   :  { %v999_v55 = vrot.slane %v992_v46, %v823_v12  ;;  %v3126_v33 = vrot.slane %v983_v8, %v839_v63 }
 0x19b   :  { %v1008_v9 = vcombine.low %v999_v55, %v1007_v11  ;;  %v3146_v49 = vcombine.high %v3126_v33, %v2889_v0 }
 0x19d   :  { %v3128_v5 = vrot.slane %v1008_v9, %v839_v63 }
 0x19f   :  { %v3142_v48 = vcombine.high %v3128_v5, %v2889_v0 }
 0x1cb   :  { %v1036_v16 = vpop.permute.xlu0 %1035  ;;  %v1043_v58 = vpop.permute.xlu1 %1042 }
 0x1cc   :  { %v1086_v61 = vmul.f32 %v1036_v16, %v3077_v47  ;;  %v1087_v62 = vmul.f32 %v1036_v16, %v3088_v56  ;;  %v1088_v1 = vmul.f32 %v1043_v58, %v3079_v14  ;;  %v1089_v2 = vmul.f32 %v1043_v58, %v3092_v17 }
 0x1ce   :  { %v1103_v10 = vsel %vm1102_vm5, %v1086_v61, 0.0  ;;  %v1118_v12 = vsel %vm1102_vm5, %v1087_v62, 0.0  ;;  %v1104_v13 = vsel %vm1102_vm5, %v1088_v1, 0.0  ;;  %v1119_v18 = vsel %vm1102_vm5, %v1089_v2, 0.0 }
 0x1cf   :  { %v1057_v23 = vpop.permute.xlu0 %1056  ;;  %v1050_v24 = vpop.permute.xlu1 %1049  ;;  %v1105_v29 = vadd.f32 %v1104_v13, %v1103_v10  ;;  %v1120_v30 = vadd.f32 %v1119_v18, %v1118_v12 }
 0x1d0   :  { %v1092_v25 = vmul.f32 %v1057_v23, %v3084_v51  ;;  %v1093_v26 = vmul.f32 %v1057_v23, %v3096_v59  ;;  %v1090_v27 = vmul.f32 %v1050_v24, %v3082_v50  ;;  %v1091_v28 = vmul.f32 %v1050_v24, %v3100_v60 }
 0x1d2   :  { %v1106_v34 = vsel %vm1102_vm5, %v1090_v27, 0.0  ;;  %v1121_v35 = vsel %vm1102_vm5, %v1091_v28, 0.0  ;;  %v1108_v36 = vsel %vm1102_vm5, %v1092_v25, 0.0  ;;  %v1123_v4 = vsel %vm1102_vm5, %v1093_v26, 0.0 }
 0x1d3   :  { %v1107_v37 = vadd.f32 %v1106_v34, %v1105_v29  ;;  %v1122_v38 = vadd.f32 %v1121_v35, %v1120_v30  ;;  %v1071_v15 = vpop.permute.xlu0 %1070  ;;  %v1064_v39 = vpop.permute.xlu1 %1063 }
 0x1d4   :  { %v1096_v40 = vmul.f32 %v1071_v15, %v3108_v7  ;;  %v1097_v41 = vmul.f32 %v1071_v15, %v3120_v31  ;;  %v1094_v42 = vmul.f32 %v1064_v39, %v3106_v6  ;;  %v1095_v63 = vmul.f32 %v1064_v39, %v3124_v32 }
 0x1d5   :  { %v1109_v43 = vadd.f32 %v1108_v36, %v1107_v37  ;;  %v1124_v44 = vadd.f32 %v1123_v4, %v1122_v38 }
 0x1d6   :  { %v1110_v45 = vsel %vm1102_vm5, %v1094_v42, 0.0  ;;  %v1125_v46 = vsel %vm1102_vm5, %v1095_v63, 0.0  ;;  %v1112_v11 = vsel %vm1102_vm5, %v1096_v40, 0.0  ;;  %v1127_v52 = vsel %vm1102_vm5, %v1097_v41, 0.0 }
 0x1d7   :  { %v1111_v53 = vadd.f32 %v1110_v45, %v1109_v43  ;;  %v1126_v54 = vadd.f32 %v1125_v46, %v1124_v44  ;;  %v1085_v55 = vpop.permute.xlu0 %1084  ;;  %v1078_v57 = vpop.permute.xlu1 %1077 }
 0x1d8   :  { %v1100_v16 = vmul.f32 %v1085_v55, %v3128_v5  ;;  %v1101_v58 = vmul.f32 %v1085_v55, %v3142_v48  ;;  %v1098_v61 = vmul.f32 %v1078_v57, %v3126_v33  ;;  %v1099_v62 = vmul.f32 %v1078_v57, %v3146_v49 }
 0x1d9   :  { %v1128_v1 = vadd.f32 %v1127_v52, %v1126_v54  ;;  %v1113_v2 = vadd.f32 %v1112_v11, %v1111_v53 }
 0x1da   :  { %v1114_v0 = vsel %vm1102_vm5, %v1098_v61, 0.0  ;;  %v1129_v8 = vsel %vm1102_vm5, %v1099_v62, 0.0  ;;  %v1131_v12 = vsel %vm1102_vm5, %v1101_v58, 0.0  ;;  %v1116_v13 = vsel %vm1102_vm5, %v1100_v16, 0.0 }
 0x1db   :  { %v1130_v9 = vadd.f32 %v1129_v8, %v1128_v1  ;;  %v1115_v10 = vadd.f32 %v1114_v0, %v1113_v2 }
 0x1dd   :  { %v1132_v18 = vadd.f32 %v1131_v12, %v1130_v9  ;;  %v1117_v23 = vadd.f32 %v1116_v13, %v1115_v10 }
 0x1df   :  { %v1134_v24 = vmul.f32 %v1132_v18, %v1132_v18  ;;  %v1133_v25 = vmul.f32 %v1117_v23, %v1117_v23 }
 0x1e1   :  { %v1138_v26 = vsel %vm1102_vm5, %v1134_v24, 0.0  ;;  %v1135_v27 = vsel %vm1102_vm5, %v1133_v25, 0.0 }
 0x1e2   :  { %1139 = vadd.xlane.f32.xlu0 %v1138_v26  ;;  %1136 = vadd.xlane.f32.xlu1 %v1135_v27 }
 0x26b   :  { %v1140_v28 = vpop.xlane.xlu0 %1139  ;;  %v1137_v29 = vpop.xlane.xlu1 %1136 }
 0x26c   :  { %v1142_v30 = vadd.f32 1e-09, %v1140_v28  ;;  %v1148_v34 = vadd.f32 1.0, %v1140_v28  ;;  %v1141_v35 = vadd.f32 1e-09, %v1137_v29  ;;  %v1147_v36 = vadd.f32 1.0, %v1137_v29 }
 0x26e   :  { %2691 = vrsqrt.f32 %v1142_v30 }
 0x26f   :  { %2693 = vrcp.f32 %v1148_v34 }
 0x270   :  { %2695 = vrsqrt.f32 %v1141_v35 }
 0x271   :  { %2697 = vrcp.f32 %v1147_v36  ;;  %v2896_v36 = vmov 1966171168  }
 0x27b   :  { %v2692_v4 = vpop.eup %2691 }
 0x27c   :  { %v2694_v37 = vpop.eup %2693  ;;  %v1146_v38 = vmul.f32 %v2692_v4, %v1140_v28  ;;  %v1158_v4 = vunpack.c.l.s4 %v2896_v36 }
 0x27d   :  { %v2696_v15 = vpop.eup %2695 }
 0x27e   :  { %v1152_v39 = vmul.f32 %v2694_v37, %v1146_v38  ;;  %v1145_v40 = vmul.f32 %v2696_v15, %v1137_v29  ;;  %v2698_v41 = vpop.eup %2697  ;;  %v1159_v37 = vunpack.c.0.s8 %v1158_v4  ;;  %v1326_v15 = vand.u32 127, %v821_v19 }
 0x280   :  { %v1154_v42 = vmul.f32 %v1152_v39, %v1132_v18  ;;  %v1150_v63 = vmul.f32 %v2698_v41, %v1145_v40  ;;  %v1162_v38 = vsub.s32 %v1159_v37, %v3051_v20  ;;  %v3196_v40 = vsub.s32 %v1326_v15, %v3051_v20 }
 0x281   :  { %v1156_v20 = vcombine.high %v2935_v3, %v2935_v3 }
 0x282   :  { %v1153_v43 = vmul.f32 %v1150_v63, %v1117_v23  ;;  %v1206_v44 = vmul.f32 %v1154_v42, %v3088_v56  ;;  %v1208_v11 = vmul.f32 %v1154_v42, %v3092_v17  ;;  %v1210_v55 = vmul.f32 %v1154_v42, %v3100_v60 }
 0x283   :  { %v1212_v61 = vmul.f32 %v1154_v42, %v3096_v59  ;;  %v1214_v0 = vmul.f32 %v1154_v42, %v3124_v32  ;;  %v1216_v12 = vmul.f32 %v1154_v42, %v3120_v31  ;;  %v1218_v24 = vmul.f32 %v1154_v42, %v3146_v49 }
 0x284   :  { %v1224_v45 = vsel %vm1102_vm5, %v1206_v44, 0.0  ;;  %v1205_v46 = vmul.f32 %v1153_v43, %v3077_v47  ;;  %v1207_v53 = vmul.f32 %v1153_v43, %v3079_v14  ;;  %v1230_v54 = vsel %vm1102_vm5, %v1208_v11, 0.0 }
 0x285   :  { %1225 = vadd.xlane.f32.xlu1 %v1224_v45  ;;  %v1209_v16 = vmul.f32 %v1153_v43, %v3082_v50  ;;  %v1236_v58 = vsel %vm1102_vm5, %v1210_v55, 0.0  ;;  %v1211_v1 = vmul.f32 %v1153_v43, %v3084_v51  ;;  %v1242_v2 = vsel %vm1102_vm5, %v1212_v61, 0.0 }
 0x286   :  { %v1221_v52 = vsel %vm1102_vm5, %v1205_v46, 0.0  ;;  %v1227_v57 = vsel %vm1102_vm5, %v1207_v53, 0.0  ;;  %v1213_v9 = vmul.f32 %v1153_v43, %v3106_v6  ;;  %v1248_v10 = vsel %vm1102_vm5, %v1214_v0, 0.0 }
 0x287   :  { %1222 = vadd.xlane.f32.xlu0 %v1221_v52  ;;  %v1233_v62 = vsel %vm1102_vm5, %v1209_v16, 0.0  ;;  %v1239_v8 = vsel %vm1102_vm5, %v1211_v1, 0.0  ;;  %v1215_v18 = vmul.f32 %v1153_v43, %v3108_v7  ;;  %v1254_v23 = vsel %vm1102_vm5, %v1216_v12, 0.0 }
 0x288   :  { %v1245_v13 = vsel %vm1102_vm5, %v1213_v9, 0.0  ;;  %v1217_v26 = vmul.f32 %v1153_v43, %v3126_v33  ;;  %v1260_v27 = vsel %vm1102_vm5, %v1218_v24, 0.0  ;;  %v1220_v28 = vmul.f32 %v1154_v42, %v3142_v48 }
 0x289   :  { %1231 = vadd.xlane.f32.xlu1 %v1230_v54  ;;  %v1251_v25 = vsel %vm1102_vm5, %v1215_v18, 0.0  ;;  %v1219_v30 = vmul.f32 %v1153_v43, %v3128_v5  ;;  %v1163_v39 = vrot.slane %v2935_v3, %v1162_v38  ;;  %v1170_v0 = vrot.slane %v1156_v20, %v1162_v38 }
 0x28a   :  { %v1257_v29 = vsel %vm1102_vm5, %v1217_v26, 0.0  ;;  %v1266_v34 = vsel %vm1102_vm5, %v1220_v28, 0.0 }
 0x28b   :  { %1228 = vadd.xlane.f32.xlu0 %v1227_v57  ;;  %v1263_v35 = vsel %vm1102_vm5, %v1219_v30, 0.0  ;;  %v1171_v41 = vcombine.high %v1163_v39, %v1163_v39  ;;  %v1179_v42 = vrot.slane %v1163_v39, %v1162_v38  ;;  %v1186_v28 = vrot.slane %v1170_v0, %v1162_v38 }
 0x28d   :  { %1237 = vadd.xlane.f32.xlu1 %v1236_v58  ;;  %v1272_v45 = vrot.slane %v1179_v42, %v3054_v21  ;;  %v1193_v46 = vrot.slane %v1171_v41, %v1162_v38  ;;  %v1201_v16 = vcombine.high %v1179_v42, %v1179_v42  ;;  %v1288_v39 = vrot.slane %v1186_v28, %v3054_v21 }
 0x28f   :  { %1234 = vadd.xlane.f32.xlu0 %v1233_v62  ;;  %v1276_v57 = vrot.slane %v1193_v46, %v3054_v21  ;;  %v1280_v9 = vrot.slane %v1201_v16, %v3054_v21 }
 0x291   :  { %1243 = vadd.xlane.f32.xlu1 %v1242_v2 }
 0x293   :  { %1240 = vadd.xlane.f32.xlu0 %v1239_v8 }
 0x295   :  { %1249 = vadd.xlane.f32.xlu1 %v1248_v10  ;;  %v1203_v10 = vcombine.high %v1193_v46, %v1193_v46 }
 0x297   :  { %1246 = vadd.xlane.f32.xlu0 %v1245_v13 }
 0x299   :  { %1255 = vadd.xlane.f32.xlu1 %v1254_v23 }
 0x29b   :  { %1252 = vadd.xlane.f32.xlu0 %v1251_v25 }
 0x29d   :  { %1261 = vadd.xlane.f32.xlu1 %v1260_v27  ;;  %v1284_v27 = vrot.slane %v1203_v10, %v3054_v21 }
 0x29f   :  { %1258 = vadd.xlane.f32.xlu0 %v1257_v29  ;;  %v1172_v29 = vcombine.high %v1170_v0, %v1170_v0 }
 0x2a1   :  { %1267 = vadd.xlane.f32.xlu1 %v1266_v34  ;;  %v1200_v41 = vrot.slane %v1172_v29, %v1162_v38 }
 0x2a3   :  { %1264 = vadd.xlane.f32.xlu0 %v1263_v35 }
 0x30e   :  { %v1226_v63 = vpop.xlane.xlu1 %1225 }
 0x30f   :  { %v1334_v43 = vrot.slane %v1226_v63, %v3196_v40 }
 0x310   :  { %v1223_v44 = vpop.xlane.xlu0 %1222 }
 0x311   :  { %v1330_v11 = vrot.slane %v1223_v44, %v3196_v40 }
 0x312   :  { %v1232_v52 = vpop.xlane.xlu1 %1231 }
 0x313   :  { %v1342_v53 = vrot.slane %v1232_v52, %v3196_v40  ;;  %v1391_v19 = vsel %vm51_vm2, %v1334_v43, %v1330_v11  ;;  %v1292_v52 = vrot.slane %v1200_v41, %v3054_v21 }
 0x314   :  { %v1229_v54 = vpop.xlane.xlu0 %1228  ;;  %v3205_v55 = vadd.f32 %v1391_v19, %v1272_v45 }
 0x315   :  { %v1338_v58 = vrot.slane %v1229_v54, %v3196_v40 }
 0x316   :  { %v1416_v61 = vsel %vm1415_vm6, %v3205_v55, -inf  ;;  %v1238_v62 = vpop.xlane.xlu1 %1237 }
 0x317   :  { %1417 = vmax.xlane.f32.xlu0 %v1416_v61  ;;  %v1350_v1 = vrot.slane %v1238_v62, %v3196_v40  ;;  %v1392_v2 = vsel %vm51_vm2, %v1342_v53, %v1338_v58  ;;  %v1202_v53 = vcombine.high %v1186_v28, %v1186_v28  ;;  %v1204_v62 = vcombine.high %v1200_v41, %v1200_v41 }
 0x318   :  { %v1235_v8 = vpop.xlane.xlu0 %1234  ;;  %v3213_v3 = vadd.f32 %v1392_v2, %v1276_v57 }
 0x319   :  { %v1346_v12 = vrot.slane %v1235_v8, %v3196_v40  ;;  %v1296_v61 = vrot.slane %v1202_v53, %v3054_v21 }
 0x31a   :  { %v1419_v13 = vsel %vm1415_vm6, %v3213_v3, -inf  ;;  %v1244_v18 = vpop.xlane.xlu1 %1243 }
 0x31b   :  { %1420 = vmax.xlane.f32.xlu1 %v1419_v13  ;;  %v1358_v23 = vrot.slane %v1244_v18, %v3196_v40  ;;  %v1393_v24 = vsel %vm51_vm2, %v1350_v1, %v1346_v12  ;;  %v1300_v13 = vrot.slane %v1204_v62, %v3054_v21 }
 0x31c   :  { %v1241_v25 = vpop.xlane.xlu0 %1240  ;;  %v3221_v26 = vadd.f32 %v1393_v24, %v1280_v9 }
 0x31d   :  { %v1354_v30 = vrot.slane %v1241_v25, %v3196_v40 }
 0x31e   :  { %v1422_v34 = vsel %vm1415_vm6, %v3221_v26, -inf  ;;  %v1250_v35 = vpop.xlane.xlu1 %1249 }
 0x31f   :  { %1423 = vmax.xlane.f32.xlu0 %v1422_v34  ;;  %v1366_v36 = vrot.slane %v1250_v35, %v3196_v40  ;;  %v1394_v4 = vsel %vm51_vm2, %v1358_v23, %v1354_v30 }
 0x320   :  { %v1247_v37 = vpop.xlane.xlu0 %1246  ;;  %v3229_v15 = vadd.f32 %v1394_v4, %v1284_v27 }
 0x321   :  { %v1362_v42 = vrot.slane %v1247_v37, %v3196_v40 }
 0x322   :  { %v1425_v63 = vsel %vm1415_vm6, %v3229_v15, -inf  ;;  %v1256_v43 = vpop.xlane.xlu1 %1255 }
 0x323   :  { %1426 = vmax.xlane.f32.xlu1 %v1425_v63  ;;  %v1374_v44 = vrot.slane %v1256_v43, %v3196_v40  ;;  %v1395_v45 = vsel %vm51_vm2, %v1366_v36, %v1362_v42 }
 0x324   :  { %v1253_v46 = vpop.xlane.xlu0 %1252  ;;  %v3237_v11 = vadd.f32 %v1395_v45, %v1288_v39 }
 0x325   :  { %v1370_v19 = vrot.slane %v1253_v46, %v3196_v40 }
 0x326   :  { %v1428_v38 = vsel %vm1415_vm6, %v3237_v11, -inf  ;;  %v1262_v20 = vpop.xlane.xlu1 %1261 }
 0x327   :  { %1429 = vmax.xlane.f32.xlu0 %v1428_v38  ;;  %v1382_v54 = vrot.slane %v1262_v20, %v3196_v40  ;;  %v1396_v57 = vsel %vm51_vm2, %v1374_v44, %v1370_v19 }
 0x328   :  { %v1259_v16 = vpop.xlane.xlu0 %1258  ;;  %v3245_v58 = vadd.f32 %v1396_v57, %v1292_v52 }
 0x329   :  { %v1378_v1 = vrot.slane %v1259_v16, %v3196_v40 }
 0x32a   :  { %v1431_v2 = vsel %vm1415_vm6, %v3245_v58, -inf  ;;  %v1268_v0 = vpop.xlane.xlu1 %1267 }
 0x32b   :  { %1432 = vmax.xlane.f32.xlu1 %v1431_v2  ;;  %v1390_v8 = vrot.slane %v1268_v0, %v3196_v40  ;;  %v1397_v9 = vsel %vm51_vm2, %v1382_v54, %v1378_v1 }
 0x32c   :  { %v1265_v10 = vpop.xlane.xlu0 %1264  ;;  %v3253_v12 = vadd.f32 %v1397_v9, %v1296_v61 }
 0x32d   :  { %v1386_v18 = vrot.slane %v1265_v10, %v3196_v40 }
 0x32e   :  { %v1434_v23 = vsel %vm1415_vm6, %v3253_v12, -inf }
 0x32f   :  { %1435 = vmax.xlane.f32.xlu0 %v1434_v23  ;;  %v1398_v24 = vsel %vm51_vm2, %v1390_v8, %v1386_v18 }
 0x330   :  { %v3260_v25 = vadd.f32 %v1398_v24, %v1300_v13 }
 0x332   :  { %v1437_v27 = vsel %vm1415_vm6, %v3260_v25, -inf }
 0x333   :  { %1438 = vmax.xlane.f32.xlu1 %v1437_v27 }
 0x3a0   :  { %v1418_v28 = vpop.xlane.xlu0 %1417 }
 0x3a1   :  { %v1440_v29 = vsub.f32 %v3205_v55, %v1418_v28 }
 0x3a3   :  { %v1448_v30 = vmul.f32 1.442695, %v1440_v29 }
 0x3a4   :  { %v1421_v34 = vpop.xlane.xlu1 %1420 }
 0x3a5   :  { %2699 = vpow2.f32 %v1448_v30  ;;  %v1441_v35 = vsub.f32 %v3213_v3, %v1421_v34 }
 0x3a7   :  { %v1450_v36 = vmul.f32 1.442695, %v1441_v35 }
 0x3a8   :  { %v1424_v4 = vpop.xlane.xlu0 %1423 }
 0x3a9   :  { %2701 = vpow2.f32 %v1450_v36  ;;  %v1442_v37 = vsub.f32 %v3221_v26, %v1424_v4 }
 0x3ab   :  { %v1452_v39 = vmul.f32 1.442695, %v1442_v37 }
 0x3ac   :  { %v1427_v41 = vpop.xlane.xlu1 %1426 }
 0x3ad   :  { %2703 = vpow2.f32 %v1452_v39  ;;  %v1443_v42 = vsub.f32 %v3229_v15, %v1427_v41 }
 0x3af   :  { %v1454_v63 = vmul.f32 1.442695, %v1443_v42 }
 0x3b0   :  { %v1430_v43 = vpop.xlane.xlu0 %1429 }
 0x3b1   :  { %2705 = vpow2.f32 %v1454_v63  ;;  %v1444_v44 = vsub.f32 %v3237_v11, %v1430_v43 }
 0x3b2   :  { %v2700_v45 = vpop.eup %2699 }
 0x3b3   :  { %v1456_v46 = vmul.f32 1.442695, %v1444_v44  ;;  %v1464_v52 = vsel %vm1415_vm6, %v2700_v45, 0.0 }
 0x3b4   :  { %1465 = vadd.xlane.f32.xlu0 %v1464_v52  ;;  %v1433_v53 = vpop.xlane.xlu1 %1432 }
 0x3b5   :  { %2707 = vpow2.f32 %v1456_v46  ;;  %v1445_v19 = vsub.f32 %v3245_v58, %v1433_v53 }
 0x3b6   :  { %v2702_v38 = vpop.eup %2701 }
 0x3b7   :  { %v1458_v20 = vmul.f32 1.442695, %v1445_v19  ;;  %v1467_v54 = vsel %vm1415_vm6, %v2702_v38, 0.0 }
 0x3b8   :  { %v1436_v57 = vpop.xlane.xlu0 %1435  ;;  %1468 = vadd.xlane.f32.xlu1 %v1467_v54 }
 0x3b9   :  { %2709 = vpow2.f32 %v1458_v20  ;;  %v1446_v16 = vsub.f32 %v3253_v12, %v1436_v57 }
 0x3ba   :  { %v2704_v61 = vpop.eup %2703 }
 0x3bb   :  { %v1460_v62 = vmul.f32 1.442695, %v1446_v16  ;;  %v1470_v1 = vsel %vm1415_vm6, %v2704_v61, 0.0 }
 0x3bc   :  { %1471 = vadd.xlane.f32.xlu0 %v1470_v1  ;;  %v1439_v2 = vpop.xlane.xlu1 %1438 }
 0x3bd   :  { %2711 = vpow2.f32 %v1460_v62  ;;  %v1447_v0 = vsub.f32 %v3260_v25, %v1439_v2 }
 0x3be   :  { %v2706_v8 = vpop.eup %2705 }
 0x3bf   :  { %v1462_v9 = vmul.f32 1.442695, %v1447_v0  ;;  %v1473_v10 = vsel %vm1415_vm6, %v2706_v8, 0.0 }
 0x3c0   :  { %1474 = vadd.xlane.f32.xlu1 %v1473_v10 }
 0x3c1   :  { %2713 = vpow2.f32 %v1462_v9 }
 0x3c2   :  { %v2708_v13 = vpop.eup %2707 }
 0x3c3   :  { %v1476_v18 = vsel %vm1415_vm6, %v2708_v13, 0.0 }
 0x3c4   :  { %1477 = vadd.xlane.f32.xlu0 %v1476_v18 }
 0x3c6   :  { %v2710_v23 = vpop.eup %2709 }
 0x3c7   :  { %v1479_v24 = vsel %vm1415_vm6, %v2710_v23, 0.0 }
 0x3c8   :  { %1480 = vadd.xlane.f32.xlu1 %v1479_v24 }
 0x3ca   :  { %v2712_v27 = vpop.eup %2711 }
 0x3cb   :  { %v1482_v28 = vsel %vm1415_vm6, %v2712_v27, 0.0 }
 0x3cc   :  { %1483 = vadd.xlane.f32.xlu0 %v1482_v28 }
 0x3ce   :  { %v2714_v29 = vpop.eup %2713 }
 0x3cf   :  { %v1485_v30 = vsel %vm1415_vm6, %v2714_v29, 0.0 }
 0x3d0   :  { %1486 = vadd.xlane.f32.xlu1 %v1485_v30 }
 0x43d   :  { %v1466_v34 = vpop.xlane.xlu0 %1465 }
 0x43e   :  { %2715 = vrcp.f32 %v1466_v34 }
 0x441   :  { %v1469_v35 = vpop.xlane.xlu1 %1468 }
 0x442   :  { %2717 = vrcp.f32 %v1469_v35 }
 0x445   :  { %v1472_v36 = vpop.xlane.xlu0 %1471 }
 0x446   :  { %2719 = vrcp.f32 %v1472_v36 }
 0x449   :  { %v1475_v4 = vpop.xlane.xlu1 %1474 }
 0x44a   :  { %2721 = vrcp.f32 %v1475_v4 }
 0x44b   :  { %v2716_v37 = vpop.eup %2715 }
 0x44c   :  { %v1489_v39 = vmul.f32 %v2716_v37, %v2700_v45 }
 0x44d   :  { %v1478_v41 = vpop.xlane.xlu0 %1477 }
 0x44e   :  { %2723 = vrcp.f32 %v1478_v41  ;;  %v1507_v42 = vrot.slane %v1489_v39, %v3054_v21  ;;  %v1514_v63 = vrot.slane %v1489_v39, %v3057_v22 }
 0x44f   :  { %v2718_v43 = vpop.eup %2717 }
 0x450   :  { %1509 = vbcast.lane.b32.xlu0 %v1507_v42, 256  ;;  %1516 = vbcast.lane.b32.xlu1 %v1514_v63, 256  ;;  %v1491_v44 = vmul.f32 %v2718_v43, %v2702_v38 }
 0x451   :  { %v1481_v46 = vpop.xlane.xlu1 %1480 }
 0x452   :  { %2725 = vrcp.f32 %v1481_v46  ;;  %v1528_v52 = vrot.slane %v1491_v44, %v3057_v22  ;;  %v1521_v53 = vrot.slane %v1491_v44, %v3054_v21 }
 0x453   :  { %v2720_v19 = vpop.eup %2719 }
 0x454   :  { %1530 = vbcast.lane.b32.xlu0 %v1528_v52, 256  ;;  %1523 = vbcast.lane.b32.xlu1 %v1521_v53, 256  ;;  %v1493_v45 = vmul.f32 %v2720_v19, %v2704_v61 }
 0x455   :  { %v1484_v20 = vpop.xlane.xlu0 %1483 }
 0x456   :  { %2727 = vrcp.f32 %v1484_v20  ;;  %v1542_v54 = vrot.slane %v1493_v45, %v3057_v22  ;;  %v1535_v57 = vrot.slane %v1493_v45, %v3054_v21 }
 0x457   :  { %v2722_v16 = vpop.eup %2721 }
 0x458   :  { %1544 = vbcast.lane.b32.xlu0 %v1542_v54, 256  ;;  %1537 = vbcast.lane.b32.xlu1 %v1535_v57, 256  ;;  %v1495_v38 = vmul.f32 %v2722_v16, %v2706_v8 }
 0x459   :  { %v1487_v62 = vpop.xlane.xlu1 %1486 }
 0x45a   :  { %2729 = vrcp.f32 %v1487_v62  ;;  %v1556_v1 = vrot.slane %v1495_v38, %v3057_v22  ;;  %v1549_v2 = vrot.slane %v1495_v38, %v3054_v21 }
 0x45b   :  { %v2724_v0 = vpop.eup %2723 }
 0x45c   :  { %1558 = vbcast.lane.b32.xlu0 %v1556_v1, 256  ;;  %1551 = vbcast.lane.b32.xlu1 %v1549_v2, 256  ;;  %v1497_v61 = vmul.f32 %v2724_v0, %v2708_v13 }
 0x45e   :  { %v1570_v9 = vrot.slane %v1497_v61, %v3057_v22  ;;  %v1563_v10 = vrot.slane %v1497_v61, %v3054_v21 }
 0x45f   :  { %v2726_v18 = vpop.eup %2725 }
 0x460   :  { %1572 = vbcast.lane.b32.xlu0 %v1570_v9, 256  ;;  %1565 = vbcast.lane.b32.xlu1 %v1563_v10, 256  ;;  %v1499_v24 = vmul.f32 %v2726_v18, %v2710_v23 }
 0x462   :  { %v1584_v8 = vrot.slane %v1499_v24, %v3057_v22  ;;  %v1577_v28 = vrot.slane %v1499_v24, %v3054_v21 }
 0x463   :  { %v2728_v30 = vpop.eup %2727 }
 0x464   :  { %1586 = vbcast.lane.b32.xlu0 %v1584_v8, 256  ;;  %1579 = vbcast.lane.b32.xlu1 %v1577_v28, 256  ;;  %v1501_v34 = vmul.f32 %v2728_v30, %v2712_v27 }
 0x466   :  { %v1598_v35 = vrot.slane %v1501_v34, %v3057_v22  ;;  %v1591_v13 = vrot.slane %v1501_v34, %v3054_v21 }
 0x467   :  { %v2730_v36 = vpop.eup %2729 }
 0x468   :  { %1600 = vbcast.lane.b32.xlu0 %v1598_v35, 256  ;;  %1593 = vbcast.lane.b32.xlu1 %v1591_v13, 256  ;;  %v1503_v4 = vmul.f32 %v2730_v36, %v2714_v29 }
 0x46a   :  { %v1612_v37 = vrot.slane %v1503_v4, %v3057_v22  ;;  %v1605_v23 = vrot.slane %v1503_v4, %v3054_v21 }
 0x46c   :  { %1614 = vbcast.lane.b32.xlu0 %v1612_v37, 256  ;;  %1607 = vbcast.lane.b32.xlu1 %v1605_v23, 256 }
 0x4c2   :  { %v1510_v39 = vpop.permute.xlu0 %1509  ;;  %v1517_v41 = vpop.permute.xlu1 %1516 }
 0x4c3   :  { %v1616_v29 = vmul.f32 %v1510_v39, %v3077_v47  ;;  %v1617_v19 = vmul.f32 %v1517_v41, %v3088_v56 }
 0x4c5   :  { %v1632_v2 = vsel %vm1102_vm5, %v1616_v29, 0.0  ;;  %v1647_v0 = vsel %vm1102_vm5, %v1617_v19, 0.0 }
 0x4c6   :  { %v1531_v42 = vpop.permute.xlu0 %1530  ;;  %v1524_v63 = vpop.permute.xlu1 %1523 }
 0x4c7   :  { %v1619_v52 = vmul.f32 %v1531_v42, %v3092_v17  ;;  %v1618_v53 = vmul.f32 %v1524_v63, %v3079_v14 }
 0x4c9   :  { %v1648_v16 = vsel %vm1102_vm5, %v1619_v52, 0.0  ;;  %v1633_v38 = vsel %vm1102_vm5, %v1618_v53, 0.0 }
 0x4ca   :  { %v1545_v43 = vpop.permute.xlu0 %1544  ;;  %v1538_v27 = vpop.permute.xlu1 %1537  ;;  %v1649_v24 = vadd.f32 %v1648_v16, %v1647_v0  ;;  %v1634_v8 = vadd.f32 %v1633_v38, %v1632_v2 }
 0x4cb   :  { %v1621_v45 = vmul.f32 %v1545_v43, %v3100_v60  ;;  %v1620_v20 = vmul.f32 %v1538_v27, %v3082_v50 }
 0x4cd   :  { %v1650_v61 = vsel %vm1102_vm5, %v1621_v45, 0.0  ;;  %v1635_v9 = vsel %vm1102_vm5, %v1620_v20, 0.0 }
 0x4ce   :  { %v1559_v44 = vpop.permute.xlu0 %1558  ;;  %v1552_v46 = vpop.permute.xlu1 %1551  ;;  %v1651_v4 = vadd.f32 %v1650_v61, %v1649_v24  ;;  %v1636_v37 = vadd.f32 %v1635_v9, %v1634_v8 }
 0x4cf   :  { %v1623_v62 = vmul.f32 %v1559_v44, %v3096_v59  ;;  %v1622_v1 = vmul.f32 %v1552_v46, %v3084_v51 }
 0x4d1   :  { %v1652_v34 = vsel %vm1102_vm5, %v1623_v62, 0.0  ;;  %v1637_v35 = vsel %vm1102_vm5, %v1622_v1, 0.0 }
 0x4d2   :  { %v1573_v54 = vpop.permute.xlu0 %1572  ;;  %v1566_v57 = vpop.permute.xlu1 %1565  ;;  %v1653_v41 = vadd.f32 %v1652_v34, %v1651_v4  ;;  %v1638_v42 = vadd.f32 %v1637_v35, %v1636_v37 }
 0x4d3   :  { %v1625_v10 = vmul.f32 %v1573_v54, %v3124_v32  ;;  %v1624_v18 = vmul.f32 %v1566_v57, %v3106_v6 }
 0x4d5   :  { %v1654_v23 = vsel %vm1102_vm5, %v1625_v10, 0.0  ;;  %v1639_v39 = vsel %vm1102_vm5, %v1624_v18, 0.0 }
 0x4d6   :  { %v1587_v28 = vpop.permute.xlu0 %1586  ;;  %v1580_v30 = vpop.permute.xlu1 %1579  ;;  %v1655_v53 = vadd.f32 %v1654_v23, %v1653_v41  ;;  %v1640_v29 = vadd.f32 %v1639_v39, %v1638_v42 }
 0x4d7   :  { %v1627_v13 = vmul.f32 %v1587_v28, %v3120_v31  ;;  %v1626_v36 = vmul.f32 %v1580_v30, %v3108_v7 }
 0x4d9   :  { %v1656_v27 = vsel %vm1102_vm5, %v1627_v13, 0.0  ;;  %v1641_v44 = vsel %vm1102_vm5, %v1626_v36, 0.0 }
 0x4da   :  { %v1601_v63 = vpop.permute.xlu0 %1600  ;;  %v1594_v43 = vpop.permute.xlu1 %1593  ;;  %v1657_v20 = vadd.f32 %v1656_v27, %v1655_v53  ;;  %v1642_v54 = vadd.f32 %v1641_v44, %v1640_v29 }
 0x4db   :  { %v1629_v46 = vmul.f32 %v1601_v63, %v3146_v49  ;;  %v1628_v52 = vmul.f32 %v1594_v43, %v3126_v33 }
 0x4dd   :  { %v1658_v19 = vsel %vm1102_vm5, %v1629_v46, 0.0  ;;  %v1643_v45 = vsel %vm1102_vm5, %v1628_v52, 0.0 }
 0x4de   :  { %v1615_v57 = vpop.permute.xlu0 %1614  ;;  %v1608_v16 = vpop.permute.xlu1 %1607  ;;  %v1659_v1 = vadd.f32 %v1658_v19, %v1657_v20  ;;  %v1644_v2 = vadd.f32 %v1643_v45, %v1642_v54 }
 0x4df   :  { %v1631_v38 = vmul.f32 %v1615_v57, %v3142_v48  ;;  %v1630_v62 = vmul.f32 %v1608_v16, %v3128_v5 }
 0x4e1   :  { %v1660_v0 = vsel %vm1102_vm5, %v1631_v38, 0.0  ;;  %v1645_v61 = vsel %vm1102_vm5, %v1630_v62, 0.0 }
 0x4e2   :  { %v1661_v9 = vadd.f32 %v1660_v0, %v1659_v1  ;;  %v1646_v10 = vadd.f32 %v1645_v61, %v1644_v2 }
 0x4e4   :  { %v1663_v18 = vmul.f32 %v1661_v9, %v1661_v9  ;;  %v1662_v24 = vmul.f32 %v1646_v10, %v1646_v10 }
 0x4e6   :  { %v1667_v8 = vsel %vm1102_vm5, %v1663_v18, 0.0  ;;  %v1664_v28 = vsel %vm1102_vm5, %v1662_v24, 0.0 }
 0x4e7   :  { %1668 = vadd.xlane.f32.xlu0 %v1667_v8  ;;  %1665 = vadd.xlane.f32.xlu1 %v1664_v28 }
 0x570   :  { %v1669_v30 = vpop.xlane.xlu0 %1668  ;;  %v1666_v34 = vpop.xlane.xlu1 %1665 }
 0x571   :  { %v1671_v35 = vadd.f32 1e-09, %v1669_v30  ;;  %v1677_v13 = vadd.f32 1.0, %v1669_v30  ;;  %v1670_v36 = vadd.f32 1e-09, %v1666_v34  ;;  %v1676_v4 = vadd.f32 1.0, %v1666_v34 }
 0x573   :  { %2731 = vrsqrt.f32 %v1671_v35 }
 0x574   :  { %2733 = vrcp.f32 %v1677_v13 }
 0x575   :  { %2735 = vrsqrt.f32 %v1670_v36 }
 0x576   :  { %2737 = vrcp.f32 %v1676_v4 }
 0x580   :  { %v2732_v37 = vpop.eup %2731 }
 0x581   :  { %v2734_v23 = vpop.eup %2733  ;;  %v1675_v39 = vmul.f32 %v2732_v37, %v1669_v30 }
 0x582   :  { %v2736_v41 = vpop.eup %2735 }
 0x583   :  { %v1681_v42 = vmul.f32 %v2734_v23, %v1675_v39  ;;  %v1674_v63 = vmul.f32 %v2736_v41, %v1666_v34  ;;  %v2738_v43 = vpop.eup %2737 }
 0x585   :  { %v1683_v27 = vmul.f32 %v1681_v42, %v1661_v9  ;;  %v1679_v44 = vmul.f32 %v2738_v43, %v1674_v63 }
 0x587   :  { %v1682_v46 = vmul.f32 %v1679_v44, %v1646_v10  ;;  %v1685_v52 = vmul.f32 %v1683_v27, %v3088_v56  ;;  %v1687_v19 = vmul.f32 %v1683_v27, %v3092_v17  ;;  %v1689_v57 = vmul.f32 %v1683_v27, %v3100_v60 }
 0x588   :  { %v1691_v1 = vmul.f32 %v1683_v27, %v3096_v59  ;;  %v1693_v9 = vmul.f32 %v1683_v27, %v3124_v32  ;;  %v1695_v8 = vmul.f32 %v1683_v27, %v3120_v31  ;;  %v1697_v35 = vmul.f32 %v1683_v27, %v3146_v49 }
 0x589   :  { %v1703_v53 = vsel %vm1102_vm5, %v1685_v52, 0.0  ;;  %v1684_v29 = vmul.f32 %v1682_v46, %v3077_v47  ;;  %v1686_v20 = vmul.f32 %v1682_v46, %v3079_v14  ;;  %v1709_v54 = vsel %vm1102_vm5, %v1687_v19, 0.0 }
 0x58a   :  { %1704 = vadd.xlane.f32.xlu1 %v1703_v53  ;;  %v1688_v38 = vmul.f32 %v1682_v46, %v3082_v50  ;;  %v1715_v62 = vsel %vm1102_vm5, %v1689_v57, 0.0  ;;  %v1690_v0 = vmul.f32 %v1682_v46, %v3084_v51  ;;  %v1721_v61 = vsel %vm1102_vm5, %v1691_v1, 0.0 }
 0x58b   :  { %v1700_v45 = vsel %vm1102_vm5, %v1684_v29, 0.0  ;;  %v1706_v16 = vsel %vm1102_vm5, %v1686_v20, 0.0  ;;  %v1692_v18 = vmul.f32 %v1682_v46, %v3106_v6  ;;  %v1727_v24 = vsel %vm1102_vm5, %v1693_v9, 0.0 }
 0x58c   :  { %1701 = vadd.xlane.f32.xlu0 %v1700_v45  ;;  %v1712_v2 = vsel %vm1102_vm5, %v1688_v38, 0.0  ;;  %v1718_v10 = vsel %vm1102_vm5, %v1690_v0, 0.0  ;;  %v1694_v30 = vmul.f32 %v1682_v46, %v3108_v7  ;;  %v1733_v34 = vsel %vm1102_vm5, %v1695_v8, 0.0 }
 0x58d   :  { %v1724_v28 = vsel %vm1102_vm5, %v1692_v18, 0.0  ;;  %v1696_v36 = vmul.f32 %v1682_v46, %v3126_v33  ;;  %v1739_v4 = vsel %vm1102_vm5, %v1697_v35, 0.0  ;;  %v1699_v37 = vmul.f32 %v1683_v27, %v3142_v48 }
 0x58e   :  { %1710 = vadd.xlane.f32.xlu1 %v1709_v54  ;;  %v1730_v13 = vsel %vm1102_vm5, %v1694_v30, 0.0  ;;  %v1698_v39 = vmul.f32 %v1682_v46, %v3128_v5 }
 0x58f   :  { %v1736_v23 = vsel %vm1102_vm5, %v1696_v36, 0.0  ;;  %v1745_v41 = vsel %vm1102_vm5, %v1699_v37, 0.0 }
 0x590   :  { %1707 = vadd.xlane.f32.xlu0 %v1706_v16  ;;  %v1742_v42 = vsel %vm1102_vm5, %v1698_v39, 0.0 }
 0x592   :  { %1716 = vadd.xlane.f32.xlu1 %v1715_v62 }
 0x594   :  { %1713 = vadd.xlane.f32.xlu0 %v1712_v2 }
 0x596   :  { %1722 = vadd.xlane.f32.xlu1 %v1721_v61 }
 0x598   :  { %1719 = vadd.xlane.f32.xlu0 %v1718_v10 }
 0x59a   :  { %1728 = vadd.xlane.f32.xlu1 %v1727_v24 }
 0x59c   :  { %1725 = vadd.xlane.f32.xlu0 %v1724_v28 }
 0x59e   :  { %1734 = vadd.xlane.f32.xlu1 %v1733_v34 }
 0x5a0   :  { %1731 = vadd.xlane.f32.xlu0 %v1730_v13 }
 0x5a2   :  { %1740 = vadd.xlane.f32.xlu1 %v1739_v4 }
 0x5a4   :  { %1737 = vadd.xlane.f32.xlu0 %v1736_v23 }
 0x5a6   :  { %1746 = vadd.xlane.f32.xlu1 %v1745_v41 }
 0x5a8   :  { %1743 = vadd.xlane.f32.xlu0 %v1742_v42 }
 0x613   :  { %v1705_v63 = vpop.xlane.xlu1 %1704 }
 0x614   :  { %v1771_v43 = vrot.slane %v1705_v63, %v3196_v40 }
 0x615   :  { %v1702_v44 = vpop.xlane.xlu0 %1701 }
 0x616   :  { %v1767_v52 = vrot.slane %v1702_v44, %v3196_v40 }
 0x617   :  { %v1711_v53 = vpop.xlane.xlu1 %1710 }
 0x618   :  { %v1828_v27 = vsel %vm51_vm2, %v1771_v43, %v1767_v52  ;;  %v1779_v29 = vrot.slane %v1711_v53, %v3196_v40 }
 0x619   :  { %v1708_v19 = vpop.xlane.xlu0 %1707  ;;  %v3367_v46 = vadd.f32 %v1828_v27, %v3205_v55 }
 0x61a   :  { %v1775_v45 = vrot.slane %v1708_v19, %v3196_v40 }
 0x61b   :  { %v1852_v20 = vsel %vm1415_vm6, %v3367_v46, -inf  ;;  %v1717_v54 = vpop.xlane.xlu1 %1716 }
 0x61c   :  { %v1829_v57 = vsel %vm51_vm2, %v1779_v29, %v1775_v45  ;;  %1853 = vmax.xlane.f32.xlu0 %v1852_v20  ;;  %v1787_v16 = vrot.slane %v1717_v54, %v3196_v40 }
 0x61d   :  { %v3375_v38 = vadd.f32 %v1829_v57, %v3213_v3  ;;  %v1714_v62 = vpop.xlane.xlu0 %1713 }
 0x61e   :  { %v1783_v1 = vrot.slane %v1714_v62, %v3196_v40 }
 0x61f   :  { %v1855_v55 = vsel %vm1415_vm6, %v3375_v38, -inf  ;;  %v1723_v2 = vpop.xlane.xlu1 %1722 }
 0x620   :  { %v1830_v0 = vsel %vm51_vm2, %v1787_v16, %v1783_v1  ;;  %1856 = vmax.xlane.f32.xlu1 %v1855_v55  ;;  %v1795_v61 = vrot.slane %v1723_v2, %v3196_v40 }
 0x621   :  { %v3383_v9 = vadd.f32 %v1830_v0, %v3221_v26  ;;  %v1720_v10 = vpop.xlane.xlu0 %1719 }
 0x622   :  { %v1791_v18 = vrot.slane %v1720_v10, %v3196_v40 }
 0x623   :  { %v1858_v3 = vsel %vm1415_vm6, %v3383_v9, -inf  ;;  %v1729_v24 = vpop.xlane.xlu1 %1728 }
 0x624   :  { %v1831_v8 = vsel %vm51_vm2, %v1795_v61, %v1791_v18  ;;  %1859 = vmax.xlane.f32.xlu0 %v1858_v3  ;;  %v1803_v28 = vrot.slane %v1729_v24, %v3196_v40 }
 0x625   :  { %v3391_v30 = vadd.f32 %v1831_v8, %v3229_v15  ;;  %v1726_v34 = vpop.xlane.xlu0 %1725 }
 0x626   :  { %v1799_v35 = vrot.slane %v1726_v34, %v3196_v40 }
 0x627   :  { %v1861_v26 = vsel %vm1415_vm6, %v3391_v30, -inf  ;;  %v1735_v13 = vpop.xlane.xlu1 %1734 }
 0x628   :  { %v1832_v36 = vsel %vm51_vm2, %v1803_v28, %v1799_v35  ;;  %1862 = vmax.xlane.f32.xlu1 %v1861_v26  ;;  %v1811_v4 = vrot.slane %v1735_v13, %v3196_v40 }
 0x629   :  { %v3399_v37 = vadd.f32 %v1832_v36, %v3237_v11  ;;  %v1732_v23 = vpop.xlane.xlu0 %1731 }
 0x62a   :  { %v1807_v39 = vrot.slane %v1732_v23, %v3196_v40 }
 0x62b   :  { %v1864_v15 = vsel %vm1415_vm6, %v3399_v37, -inf  ;;  %v1741_v41 = vpop.xlane.xlu1 %1740 }
 0x62c   :  { %v1833_v42 = vsel %vm51_vm2, %v1811_v4, %v1807_v39  ;;  %1865 = vmax.xlane.f32.xlu0 %v1864_v15  ;;  %v1819_v63 = vrot.slane %v1741_v41, %v3196_v40 }
 0x62d   :  { %v3407_v43 = vadd.f32 %v1833_v42, %v3245_v58  ;;  %v1738_v44 = vpop.xlane.xlu0 %1737 }
 0x62e   :  { %v1815_v52 = vrot.slane %v1738_v44, %v3196_v40 }
 0x62f   :  { %v1867_v11 = vsel %vm1415_vm6, %v3407_v43, -inf  ;;  %v1747_v53 = vpop.xlane.xlu1 %1746 }
 0x630   :  { %v1834_v27 = vsel %vm51_vm2, %v1819_v63, %v1815_v52  ;;  %1868 = vmax.xlane.f32.xlu1 %v1867_v11  ;;  %v1827_v29 = vrot.slane %v1747_v53, %v3196_v40 }
 0x631   :  { %v3415_v19 = vadd.f32 %v1834_v27, %v3253_v12  ;;  %v1744_v45 = vpop.xlane.xlu0 %1743 }
 0x632   :  { %v1823_v20 = vrot.slane %v1744_v45, %v3196_v40 }
 0x633   :  { %v1870_v58 = vsel %vm1415_vm6, %v3415_v19, -inf }
 0x634   :  { %v1835_v54 = vsel %vm51_vm2, %v1827_v29, %v1823_v20  ;;  %1871 = vmax.xlane.f32.xlu0 %v1870_v58 }
 0x635   :  { %v3422_v57 = vadd.f32 %v1835_v54, %v3260_v25 }
 0x637   :  { %v1873_v16 = vsel %vm1415_vm6, %v3422_v57, -inf }
 0x638   :  { %1874 = vmax.xlane.f32.xlu1 %v1873_v16 }
 0x6a5   :  { %v1854_v62 = vpop.xlane.xlu0 %1853 }
 0x6a6   :  { %v1876_v12 = vsub.f32 %v3367_v46, %v1854_v62 }
 0x6a8   :  { %v1884_v1 = vmul.f32 1.442695, %v1876_v12 }
 0x6a9   :  { %v1857_v55 = vpop.xlane.xlu1 %1856 }
 0x6aa   :  { %2739 = vpow2.f32 %v1884_v1  ;;  %v1877_v2 = vsub.f32 %v3375_v38, %v1857_v55 }
 0x6ac   :  { %v1886_v0 = vmul.f32 1.442695, %v1877_v2 }
 0x6ad   :  { %v1860_v61 = vpop.xlane.xlu0 %1859 }
 0x6ae   :  { %2741 = vpow2.f32 %v1886_v0  ;;  %v1878_v10 = vsub.f32 %v3383_v9, %v1860_v61 }
 0x6b0   :  { %v1888_v18 = vmul.f32 1.442695, %v1878_v10 }
 0x6b1   :  { %v1863_v25 = vpop.xlane.xlu1 %1862 }
 0x6b2   :  { %2743 = vpow2.f32 %v1888_v18  ;;  %v1879_v3 = vsub.f32 %v3391_v30, %v1863_v25 }
 0x6b4   :  { %v1890_v24 = vmul.f32 1.442695, %v1879_v3 }
 0x6b5   :  { %v1866_v8 = vpop.xlane.xlu0 %1865 }
 0x6b6   :  { %2745 = vpow2.f32 %v1890_v24  ;;  %v1880_v28 = vsub.f32 %v3399_v37, %v1866_v8 }
 0x6b7   :  { %v2740_v34 = vpop.eup %2739 }
 0x6b8   :  { %v1892_v35 = vmul.f32 1.442695, %v1880_v28  ;;  %v1900_v26 = vsel %vm1415_vm6, %v2740_v34, 0.0 }
 0x6b9   :  { %1901 = vadd.xlane.f32.xlu0 %v1900_v26  ;;  %v1869_v13 = vpop.xlane.xlu1 %1868 }
 0x6ba   :  { %2747 = vpow2.f32 %v1892_v35  ;;  %v1881_v36 = vsub.f32 %v3407_v43, %v1869_v13 }
 0x6bb   :  { %v2742_v4 = vpop.eup %2741 }
 0x6bc   :  { %v1894_v23 = vmul.f32 1.442695, %v1881_v36  ;;  %v1903_v39 = vsel %vm1415_vm6, %v2742_v4, 0.0 }
 0x6bd   :  { %v1872_v15 = vpop.xlane.xlu0 %1871  ;;  %1904 = vadd.xlane.f32.xlu1 %v1903_v39 }
 0x6be   :  { %2749 = vpow2.f32 %v1894_v23  ;;  %v1882_v41 = vsub.f32 %v3415_v19, %v1872_v15 }
 0x6bf   :  { %v2744_v42 = vpop.eup %2743 }
 0x6c0   :  { %v1896_v63 = vmul.f32 1.442695, %v1882_v41  ;;  %v1906_v44 = vsel %vm1415_vm6, %v2744_v42, 0.0 }
 0x6c1   :  { %1907 = vadd.xlane.f32.xlu0 %v1906_v44  ;;  %v1875_v52 = vpop.xlane.xlu1 %1874 }
 0x6c2   :  { %2751 = vpow2.f32 %v1896_v63  ;;  %v1883_v11 = vsub.f32 %v3422_v57, %v1875_v52 }
 0x6c3   :  { %v2746_v53 = vpop.eup %2745 }
 0x6c4   :  { %v1898_v27 = vmul.f32 1.442695, %v1883_v11  ;;  %v1909_v29 = vsel %vm1415_vm6, %v2746_v53, 0.0 }
 0x6c5   :  { %1910 = vadd.xlane.f32.xlu1 %v1909_v29 }
 0x6c6   :  { %2753 = vpow2.f32 %v1898_v27 }
 0x6c7   :  { %v2748_v45 = vpop.eup %2747 }
 0x6c8   :  { %v1912_v20 = vsel %vm1415_vm6, %v2748_v45, 0.0 }
 0x6c9   :  { %1913 = vadd.xlane.f32.xlu0 %v1912_v20 }
 0x6cb   :  { %v2750_v58 = vpop.eup %2749 }
 0x6cc   :  { %v1915_v54 = vsel %vm1415_vm6, %v2750_v58, 0.0 }
 0x6cd   :  { %1916 = vadd.xlane.f32.xlu1 %v1915_v54 }
 0x6cf   :  { %v2752_v16 = vpop.eup %2751 }
 0x6d0   :  { %v1918_v62 = vsel %vm1415_vm6, %v2752_v16, 0.0 }
 0x6d1   :  { %1919 = vadd.xlane.f32.xlu0 %v1918_v62 }
 0x6d3   :  { %v2754_v12 = vpop.eup %2753 }
 0x6d4   :  { %v1921_v1 = vsel %vm1415_vm6, %v2754_v12, 0.0 }
 0x6d5   :  { %1922 = vadd.xlane.f32.xlu1 %v1921_v1 }
 0x742   :  { %v1902_v55 = vpop.xlane.xlu0 %1901 }
 0x743   :  { %2755 = vrcp.f32 %v1902_v55 }
 0x746   :  { %v1905_v2 = vpop.xlane.xlu1 %1904 }
 0x747   :  { %2757 = vrcp.f32 %v1905_v2 }
 0x74a   :  { %v1908_v0 = vpop.xlane.xlu0 %1907 }
 0x74b   :  { %2759 = vrcp.f32 %v1908_v0 }
 0x74e   :  { %v1911_v61 = vpop.xlane.xlu1 %1910 }
 0x74f   :  { %2761 = vrcp.f32 %v1911_v61 }
 0x750   :  { %v2756_v10 = vpop.eup %2755 }
 0x751   :  { %v1925_v18 = vmul.f32 %v2756_v10, %v2740_v34 }
 0x752   :  { %v1914_v25 = vpop.xlane.xlu0 %1913 }
 0x753   :  { %2763 = vrcp.f32 %v1914_v25  ;;  %v1943_v3 = vrot.slane %v1925_v18, %v3054_v21  ;;  %v1950_v24 = vrot.slane %v1925_v18, %v3057_v22 }
 0x754   :  { %v2758_v8 = vpop.eup %2757 }
 0x755   :  { %1945 = vbcast.lane.b32.xlu0 %v1943_v3, 256  ;;  %1952 = vbcast.lane.b32.xlu1 %v1950_v24, 256  ;;  %v1927_v28 = vmul.f32 %v2758_v8, %v2742_v4 }
 0x756   :  { %v1917_v35 = vpop.xlane.xlu1 %1916 }
 0x757   :  { %2765 = vrcp.f32 %v1917_v35  ;;  %v1964_v26 = vrot.slane %v1927_v28, %v3057_v22  ;;  %v1957_v13 = vrot.slane %v1927_v28, %v3054_v21 }
 0x758   :  { %v2760_v36 = vpop.eup %2759 }
 0x759   :  { %1966 = vbcast.lane.b32.xlu0 %v1964_v26, 256  ;;  %1959 = vbcast.lane.b32.xlu1 %v1957_v13, 256  ;;  %v1929_v34 = vmul.f32 %v2760_v36, %v2744_v42 }
 0x75a   :  { %v1920_v23 = vpop.xlane.xlu0 %1919 }
 0x75b   :  { %2767 = vrcp.f32 %v1920_v23  ;;  %v1978_v39 = vrot.slane %v1929_v34, %v3057_v22  ;;  %v1971_v15 = vrot.slane %v1929_v34, %v3054_v21 }
 0x75c   :  { %v2762_v41 = vpop.eup %2761 }
 0x75d   :  { %1980 = vbcast.lane.b32.xlu0 %v1978_v39, 256  ;;  %1973 = vbcast.lane.b32.xlu1 %v1971_v15, 256  ;;  %v1931_v4 = vmul.f32 %v2762_v41, %v2746_v53 }
 0x75e   :  { %v1923_v63 = vpop.xlane.xlu1 %1922 }
 0x75f   :  { %2769 = vrcp.f32 %v1923_v63  ;;  %v1992_v44 = vrot.slane %v1931_v4, %v3057_v22  ;;  %v1985_v52 = vrot.slane %v1931_v4, %v3054_v21 }
 0x760   :  { %v2764_v11 = vpop.eup %2763 }
 0x761   :  { %1994 = vbcast.lane.b32.xlu0 %v1992_v44, 256  ;;  %1987 = vbcast.lane.b32.xlu1 %v1985_v52, 256  ;;  %v1933_v42 = vmul.f32 %v2764_v11, %v2748_v45 }
 0x763   :  { %v2006_v27 = vrot.slane %v1933_v42, %v3057_v22  ;;  %v1999_v29 = vrot.slane %v1933_v42, %v3054_v21 }
 0x764   :  { %v2766_v20 = vpop.eup %2765 }
 0x765   :  { %2008 = vbcast.lane.b32.xlu0 %v2006_v27, 256  ;;  %2001 = vbcast.lane.b32.xlu1 %v1999_v29, 256  ;;  %v1935_v54 = vmul.f32 %v2766_v20, %v2750_v58 }
 0x767   :  { %v2020_v53 = vrot.slane %v1935_v54, %v3057_v22  ;;  %v2013_v62 = vrot.slane %v1935_v54, %v3054_v21 }
 0x768   :  { %v2768_v1 = vpop.eup %2767 }
 0x769   :  { %2022 = vbcast.lane.b32.xlu0 %v2020_v53, 256  ;;  %2015 = vbcast.lane.b32.xlu1 %v2013_v62, 256  ;;  %v1937_v55 = vmul.f32 %v2768_v1, %v2752_v16 }
 0x76b   :  { %v2034_v2 = vrot.slane %v1937_v55, %v3057_v22  ;;  %v2027_v45 = vrot.slane %v1937_v55, %v3054_v21 }
 0x76c   :  { %v2770_v0 = vpop.eup %2769 }
 0x76d   :  { %2036 = vbcast.lane.b32.xlu0 %v2034_v2, 256  ;;  %2029 = vbcast.lane.b32.xlu1 %v2027_v45, 256  ;;  %v1939_v61 = vmul.f32 %v2770_v0, %v2754_v12 }
 0x76f   :  { %v2048_v10 = vrot.slane %v1939_v61, %v3057_v22  ;;  %v2041_v58 = vrot.slane %v1939_v61, %v3054_v21 }
 0x771   :  { %2050 = vbcast.lane.b32.xlu0 %v2048_v10, 256  ;;  %2043 = vbcast.lane.b32.xlu1 %v2041_v58, 256 }
 0x7c7   :  { %v1946_v18 = vpop.permute.xlu0 %1945  ;;  %v1953_v25 = vpop.permute.xlu1 %1952 }
 0x7c8   :  { %v2052_v12 = vmul.f32 %v1946_v18, %v3077_v47  ;;  %v2053_v36 = vmul.f32 %v1953_v25, %v3088_v56 }
 0x7ca   :  { %v2068_v52 = vsel %vm1102_vm5, %v2052_v12, 0.0  ;;  %v2083_v11 = vsel %vm1102_vm5, %v2053_v36, 0.0 }
 0x7cb   :  { %v1967_v3 = vpop.permute.xlu0 %1966  ;;  %v1960_v24 = vpop.permute.xlu1 %1959 }
 0x7cc   :  { %v2055_v26 = vmul.f32 %v1967_v3, %v3092_v17  ;;  %v2054_v13 = vmul.f32 %v1960_v24, %v3079_v14 }
 0x7ce   :  { %v2084_v41 = vsel %vm1102_vm5, %v2055_v26, 0.0  ;;  %v2069_v4 = vsel %vm1102_vm5, %v2054_v13, 0.0 }
 0x7cf   :  { %v1981_v8 = vpop.permute.xlu0 %1980  ;;  %v1974_v16 = vpop.permute.xlu1 %1973  ;;  %v2085_v54 = vadd.f32 %v2084_v41, %v2083_v11  ;;  %v2070_v53 = vadd.f32 %v2069_v4, %v2068_v52 }
 0x7d0   :  { %v2057_v34 = vmul.f32 %v1981_v8, %v3100_v60  ;;  %v2056_v23 = vmul.f32 %v1974_v16, %v3082_v50 }
 0x7d2   :  { %v2086_v42 = vsel %vm1102_vm5, %v2057_v34, 0.0  ;;  %v2071_v27 = vsel %vm1102_vm5, %v2056_v23, 0.0 }
 0x7d3   :  { %v1995_v28 = vpop.permute.xlu0 %1994  ;;  %v1988_v35 = vpop.permute.xlu1 %1987  ;;  %v2087_v61 = vadd.f32 %v2086_v42, %v2085_v54  ;;  %v2072_v10 = vadd.f32 %v2071_v27, %v2070_v53 }
 0x7d4   :  { %v2059_v63 = vmul.f32 %v1995_v28, %v3096_v59  ;;  %v2058_v44 = vmul.f32 %v1988_v35, %v3084_v51 }
 0x7d6   :  { %v2088_v55 = vsel %vm1102_vm5, %v2059_v63, 0.0  ;;  %v2073_v2 = vsel %vm1102_vm5, %v2058_v44, 0.0 }
 0x7d7   :  { %v2009_v39 = vpop.permute.xlu0 %2008  ;;  %v2002_v15 = vpop.permute.xlu1 %2001  ;;  %v2089_v25 = vadd.f32 %v2088_v55, %v2087_v61  ;;  %v2074_v3 = vadd.f32 %v2073_v2, %v2072_v10 }
 0x7d8   :  { %v2061_v29 = vmul.f32 %v2009_v39, %v3124_v32  ;;  %v2060_v20 = vmul.f32 %v2002_v15, %v3106_v6 }
 0x7da   :  { %v2090_v58 = vsel %vm1102_vm5, %v2061_v29, 0.0  ;;  %v2075_v18 = vsel %vm1102_vm5, %v2060_v20, 0.0 }
 0x7db   :  { %v2023_v62 = vpop.permute.xlu0 %2022  ;;  %v2016_v1 = vpop.permute.xlu1 %2015  ;;  %v2091_v13 = vadd.f32 %v2090_v58, %v2089_v25  ;;  %v2076_v12 = vadd.f32 %v2075_v18, %v2074_v3 }
 0x7dc   :  { %v2063_v45 = vmul.f32 %v2023_v62, %v3120_v31  ;;  %v2062_v0 = vmul.f32 %v2016_v1, %v3108_v7 }
 0x7de   :  { %v2092_v16 = vsel %vm1102_vm5, %v2063_v45, 0.0  ;;  %v2077_v28 = vsel %vm1102_vm5, %v2062_v0, 0.0 }
 0x7df   :  { %v2037_v24 = vpop.permute.xlu0 %2036  ;;  %v2030_v8 = vpop.permute.xlu1 %2029  ;;  %v2093_v23 = vadd.f32 %v2092_v16, %v2091_v13  ;;  %v2078_v39 = vadd.f32 %v2077_v28, %v2076_v12 }
 0x7e0   :  { %v2065_v35 = vmul.f32 %v2037_v24, %v3146_v49  ;;  %v2064_v26 = vmul.f32 %v2030_v8, %v3126_v33 }
 0x7e2   :  { %v2094_v36 = vsel %vm1102_vm5, %v2065_v35, 0.0  ;;  %v2079_v34 = vsel %vm1102_vm5, %v2064_v26, 0.0 }
 0x7e3   :  { %v2051_v15 = vpop.permute.xlu0 %2050  ;;  %v2044_v41 = vpop.permute.xlu1 %2043  ;;  %v2095_v44 = vadd.f32 %v2094_v36, %v2093_v23  ;;  %v2080_v52 = vadd.f32 %v2079_v34, %v2078_v39 }
 0x7e4   :  { %v2067_v4 = vmul.f32 %v2051_v15, %v3142_v48  ;;  %v2066_v63 = vmul.f32 %v2044_v41, %v3128_v5 }
 0x7e6   :  { %v2096_v11 = vsel %vm1102_vm5, %v2067_v4, 0.0  ;;  %v2081_v42 = vsel %vm1102_vm5, %v2066_v63, 0.0 }
 0x7e7   :  { %v2097_v27 = vadd.f32 %v2096_v11, %v2095_v44  ;;  %v2082_v29 = vadd.f32 %v2081_v42, %v2080_v52 }
 0x7e9   :  { %v2099_v20 = vmul.f32 %v2097_v27, %v2097_v27  ;;  %v2098_v54 = vmul.f32 %v2082_v29, %v2082_v29 }
 0x7eb   :  { %v2103_v53 = vsel %vm1102_vm5, %v2099_v20, 0.0  ;;  %v2100_v62 = vsel %vm1102_vm5, %v2098_v54, 0.0 }
 0x7ec   :  { %2104 = vadd.xlane.f32.xlu0 %v2103_v53  ;;  %2101 = vadd.xlane.f32.xlu1 %v2100_v62 }
 0x875   :  { %v2105_v1 = vpop.xlane.xlu0 %2104  ;;  %v2102_v55 = vpop.xlane.xlu1 %2101 }
 0x876   :  { %v2107_v2 = vadd.f32 1e-09, %v2105_v1  ;;  %v2113_v45 = vadd.f32 1.0, %v2105_v1  ;;  %v2106_v0 = vadd.f32 1e-09, %v2102_v55  ;;  %v2112_v61 = vadd.f32 1.0, %v2102_v55 }
 0x878   :  { %2771 = vrsqrt.f32 %v2107_v2 }
 0x879   :  { %2773 = vrcp.f32 %v2113_v45 }
 0x87a   :  { %2775 = vrsqrt.f32 %v2106_v0 }
 0x87b   :  { %2777 = vrcp.f32 %v2112_v61 }
 0x885   :  { %v2772_v10 = vpop.eup %2771 }
 0x886   :  { %v2774_v58 = vpop.eup %2773  ;;  %v2111_v18 = vmul.f32 %v2772_v10, %v2105_v1 }
 0x887   :  { %v2776_v25 = vpop.eup %2775 }
 0x888   :  { %v2117_v3 = vmul.f32 %v2774_v58, %v2111_v18  ;;  %v2110_v24 = vmul.f32 %v2776_v25, %v2102_v55  ;;  %v2778_v8 = vpop.eup %2777 }
 0x88a   :  { %v2119_v16 = vmul.f32 %v2117_v3, %v2097_v27  ;;  %v2115_v28 = vmul.f32 %v2778_v8, %v2110_v24 }
 0x88c   :  { %v2118_v35 = vmul.f32 %v2115_v28, %v2082_v29  ;;  %v2121_v26 = vmul.f32 %v2119_v16, %v3088_v56  ;;  %v2123_v36 = vmul.f32 %v2119_v16, %v3092_v17  ;;  %v2125_v15 = vmul.f32 %v2119_v16, %v3100_v60 }
 0x88d   :  { %v2127_v44 = vmul.f32 %v2119_v16, %v3096_v59  ;;  %v2129_v27 = vmul.f32 %v2119_v16, %v3124_v32  ;;  %v2131_v53 = vmul.f32 %v2119_v16, %v3120_v31  ;;  %v2133_v2 = vmul.f32 %v2119_v16, %v3146_v49 }
 0x88e   :  { %v2139_v13 = vsel %vm1102_vm5, %v2121_v26, 0.0  ;;  %v2120_v12 = vmul.f32 %v2118_v35, %v3077_v47  ;;  %v2122_v23 = vmul.f32 %v2118_v35, %v3079_v14  ;;  %v2145_v39 = vsel %vm1102_vm5, %v2123_v36, 0.0 }
 0x88f   :  { %2140 = vadd.xlane.f32.xlu1 %v2139_v13  ;;  %v2124_v4 = vmul.f32 %v2118_v35, %v3082_v50  ;;  %v2151_v63 = vsel %vm1102_vm5, %v2125_v15, 0.0  ;;  %v2126_v11 = vmul.f32 %v2118_v35, %v3084_v51  ;;  %v2157_v42 = vsel %vm1102_vm5, %v2127_v44, 0.0 }
 0x890   :  { %v2136_v34 = vsel %vm1102_vm5, %v2120_v12, 0.0  ;;  %v2142_v41 = vsel %vm1102_vm5, %v2122_v23, 0.0  ;;  %v2128_v20 = vmul.f32 %v2118_v35, %v3106_v6  ;;  %v2163_v54 = vsel %vm1102_vm5, %v2129_v27, 0.0 }
 0x891   :  { %2137 = vadd.xlane.f32.xlu0 %v2136_v34  ;;  %v2148_v52 = vsel %vm1102_vm5, %v2124_v4, 0.0  ;;  %v2154_v29 = vsel %vm1102_vm5, %v2126_v11, 0.0  ;;  %v2130_v1 = vmul.f32 %v2118_v35, %v3108_v7  ;;  %v2169_v55 = vsel %vm1102_vm5, %v2131_v53, 0.0 }
 0x892   :  { %v2160_v62 = vsel %vm1102_vm5, %v2128_v20, 0.0  ;;  %v2132_v0 = vmul.f32 %v2118_v35, %v3126_v33  ;;  %v2175_v61 = vsel %vm1102_vm5, %v2133_v2, 0.0  ;;  %v2135_v10 = vmul.f32 %v2119_v16, %v3142_v48 }
 0x893   :  { %2146 = vadd.xlane.f32.xlu1 %v2145_v39  ;;  %v2166_v45 = vsel %vm1102_vm5, %v2130_v1, 0.0  ;;  %v2134_v18 = vmul.f32 %v2118_v35, %v3128_v5 }
 0x894   :  { %v2172_v58 = vsel %vm1102_vm5, %v2132_v0, 0.0  ;;  %v2181_v25 = vsel %vm1102_vm5, %v2135_v10, 0.0 }
 0x895   :  { %2143 = vadd.xlane.f32.xlu0 %v2142_v41  ;;  %v2178_v3 = vsel %vm1102_vm5, %v2134_v18, 0.0 }
 0x897   :  { %2152 = vadd.xlane.f32.xlu1 %v2151_v63 }
 0x899   :  { %2149 = vadd.xlane.f32.xlu0 %v2148_v52 }
 0x89b   :  { %2158 = vadd.xlane.f32.xlu1 %v2157_v42 }
 0x89d   :  { %2155 = vadd.xlane.f32.xlu0 %v2154_v29 }
 0x89f   :  { %2164 = vadd.xlane.f32.xlu1 %v2163_v54 }
 0x8a1   :  { %2161 = vadd.xlane.f32.xlu0 %v2160_v62 }
 0x8a3   :  { %2170 = vadd.xlane.f32.xlu1 %v2169_v55 }
 0x8a5   :  { %2167 = vadd.xlane.f32.xlu0 %v2166_v45 }
 0x8a7   :  { %2176 = vadd.xlane.f32.xlu1 %v2175_v61 }
 0x8a9   :  { %2173 = vadd.xlane.f32.xlu0 %v2172_v58 }
 0x8ab   :  { %2182 = vadd.xlane.f32.xlu1 %v2181_v25 }
 0x8ad   :  { %2179 = vadd.xlane.f32.xlu0 %v2178_v3 }
 0x918   :  { %v2141_v24 = vpop.xlane.xlu1 %2140 }
 0x919   :  { %v2207_v8 = vrot.slane %v2141_v24, %v3196_v40 }
 0x91a   :  { %v2138_v28 = vpop.xlane.xlu0 %2137 }
 0x91b   :  { %v2203_v26 = vrot.slane %v2138_v28, %v3196_v40 }
 0x91c   :  { %v2147_v13 = vpop.xlane.xlu1 %2146 }
 0x91d   :  { %v2215_v16 = vrot.slane %v2147_v13, %v3196_v40  ;;  %v2264_v12 = vsel %vm51_vm2, %v2207_v8, %v2203_v26 }
 0x91e   :  { %v2144_v36 = vpop.xlane.xlu0 %2143  ;;  %v2280_v35 = vadd.f32 %v2264_v12, %v3367_v46 }
 0x91f   :  { %v2211_v34 = vrot.slane %v2144_v36, %v3196_v40 }
 0x920   :  { %v2288_v23 = vsel %vm1415_vm6, %v2280_v35, -inf  ;;  %v2153_v39 = vpop.xlane.xlu1 %2152 }
 0x921   :  { %2289 = vmax.xlane.f32.xlu0 %v2288_v23  ;;  %v2223_v15 = vrot.slane %v2153_v39, %v3196_v40  ;;  %v2265_v41 = vsel %vm51_vm2, %v2215_v16, %v2211_v34 }
 0x922   :  { %v2150_v4 = vpop.xlane.xlu0 %2149  ;;  %v2281_v63 = vadd.f32 %v2265_v41, %v3375_v38 }
 0x923   :  { %v2219_v44 = vrot.slane %v2150_v4, %v3196_v40 }
 0x924   :  { %v2291_v52 = vsel %vm1415_vm6, %v2281_v63, -inf  ;;  %v2159_v11 = vpop.xlane.xlu1 %2158 }
 0x925   :  { %2292 = vmax.xlane.f32.xlu1 %v2291_v52  ;;  %v2231_v46 = vrot.slane %v2159_v11, %v3196_v40  ;;  %v2266_v42 = vsel %vm51_vm2, %v2223_v15, %v2219_v44 }
 0x926   :  { %v2156_v27 = vpop.xlane.xlu0 %2155  ;;  %v2282_v29 = vadd.f32 %v2266_v42, %v3383_v9 }
 0x927   :  { %v2227_v20 = vrot.slane %v2156_v27, %v3196_v40 }
 0x928   :  { %v2294_v54 = vsel %vm1415_vm6, %v2282_v29, -inf  ;;  %v2165_v53 = vpop.xlane.xlu1 %2164 }
 0x929   :  { %2295 = vmax.xlane.f32.xlu0 %v2294_v54  ;;  %v2239_v38 = vrot.slane %v2165_v53, %v3196_v40  ;;  %v2267_v62 = vsel %vm51_vm2, %v2231_v46, %v2227_v20 }
 0x92a   :  { %v2162_v1 = vpop.xlane.xlu0 %2161  ;;  %v2283_v55 = vadd.f32 %v2267_v62, %v3391_v30 }
 0x92b   :  { %v2235_v2 = vrot.slane %v2162_v1, %v3196_v40 }
 0x92c   :  { %v2297_v45 = vsel %vm1415_vm6, %v2283_v55, -inf  ;;  %v2171_v0 = vpop.xlane.xlu1 %2170 }
 0x92d   :  { %2298 = vmax.xlane.f32.xlu1 %v2297_v45  ;;  %v2247_v9 = vrot.slane %v2171_v0, %v3196_v40  ;;  %v2268_v61 = vsel %vm51_vm2, %v2239_v38, %v2235_v2 }
 0x92e   :  { %v2168_v10 = vpop.xlane.xlu0 %2167  ;;  %v2284_v58 = vadd.f32 %v2268_v61, %v3399_v37 }
 0x92f   :  { %v2243_v18 = vrot.slane %v2168_v10, %v3196_v40 }
 0x930   :  { %v2300_v25 = vsel %vm1415_vm6, %v2284_v58, -inf  ;;  %v2177_v3 = vpop.xlane.xlu1 %2176 }
 0x931   :  { %2301 = vmax.xlane.f32.xlu0 %v2300_v25  ;;  %v2255_v30 = vrot.slane %v2177_v3, %v3196_v40  ;;  %v2269_v24 = vsel %vm51_vm2, %v2247_v9, %v2243_v18 }
 0x932   :  { %v2174_v8 = vpop.xlane.xlu0 %2173  ;;  %v2285_v28 = vadd.f32 %v2269_v24, %v3407_v43 }
 0x933   :  { %v2251_v26 = vrot.slane %v2174_v8, %v3196_v40 }
 0x934   :  { %v2303_v13 = vsel %vm1415_vm6, %v2285_v28, -inf  ;;  %v2183_v16 = vpop.xlane.xlu1 %2182 }
 0x935   :  { %2304 = vmax.xlane.f32.xlu1 %v2303_v13  ;;  %v2263_v37 = vrot.slane %v2183_v16, %v3196_v40  ;;  %v2270_v12 = vsel %vm51_vm2, %v2255_v30, %v2251_v26 }
 0x936   :  { %v2180_v36 = vpop.xlane.xlu0 %2179  ;;  %v2286_v34 = vadd.f32 %v2270_v12, %v3415_v19 }
 0x937   :  { %v2259_v23 = vrot.slane %v2180_v36, %v3196_v40 }
 0x938   :  { %v2306_v39 = vsel %vm1415_vm6, %v2286_v34, -inf }
 0x939   :  { %2307 = vmax.xlane.f32.xlu0 %v2306_v39  ;;  %v2271_v43 = vsel %vm51_vm2, %v2263_v37, %v2259_v23 }
 0x93a   :  { %v2287_v15 = vadd.f32 %v2271_v43, %v3422_v57 }
 0x93c   :  { %v2309_v41 = vsel %vm1415_vm6, %v2287_v15, -inf }
 0x93d   :  { %2310 = vmax.xlane.f32.xlu1 %v2309_v41 }
 0x9aa   :  { %v2290_v4 = vpop.xlane.xlu0 %2289 }
 0x9ab   :  { %v2312_v44 = vsub.f32 %v2280_v35, %v2290_v4 }
 0x9ad   :  { %v2320_v52 = vmul.f32 1.442695, %v2312_v44 }
 0x9ae   :  { %v2293_v11 = vpop.xlane.xlu1 %2292 }
 0x9af   :  { %2779 = vpow2.f32 %v2320_v52  ;;  %v2313_v46 = vsub.f32 %v2281_v63, %v2293_v11 }
 0x9b1   :  { %v2322_v42 = vmul.f32 1.442695, %v2313_v46 }
 0x9b2   :  { %v2296_v19 = vpop.xlane.xlu0 %2295 }
 0x9b3   :  { %2781 = vpow2.f32 %v2322_v42  ;;  %v2314_v40 = vsub.f32 %v2282_v29, %v2296_v19 }
 0x9b5   :  { %v2324_v27 = vmul.f32 1.442695, %v2314_v40 }
 0x9b6   :  { %v2299_v20 = vpop.xlane.xlu1 %2298 }
 0x9b7   :  { %2783 = vpow2.f32 %v2324_v27  ;;  %v2315_v54 = vsub.f32 %v2283_v55, %v2299_v20 }
 0x9b9   :  { %v2326_v53 = vmul.f32 1.442695, %v2315_v54 }
 0x9ba   :  { %v2302_v38 = vpop.xlane.xlu0 %2301 }
 0x9bb   :  { %2785 = vpow2.f32 %v2326_v53  ;;  %v2316_v57 = vsub.f32 %v2284_v58, %v2302_v38 }
 0x9bc   :  { %v2780_v62 = vpop.eup %2779 }
 0x9bd   :  { %v2328_v1 = vmul.f32 1.442695, %v2316_v57  ;;  %v2336_v35 = vsel %vm1415_vm6, %v2780_v62, 0.0 }
 0x9be   :  { %2337 = vadd.xlane.f32.xlu0 %v2336_v35  ;;  %v2305_v2 = vpop.xlane.xlu1 %2304 }
 0x9bf   :  { %2787 = vpow2.f32 %v2328_v1  ;;  %v2317_v63 = vsub.f32 %v2285_v28, %v2305_v2 }
 0x9c0   :  { %v2782_v45 = vpop.eup %2781 }
 0x9c1   :  { %v2330_v0 = vmul.f32 1.442695, %v2317_v63  ;;  %v2339_v29 = vsel %vm1415_vm6, %v2782_v45, 0.0 }
 0x9c2   :  { %v2308_v9 = vpop.xlane.xlu0 %2307  ;;  %2340 = vadd.xlane.f32.xlu1 %v2339_v29 }
 0x9c3   :  { %2789 = vpow2.f32 %v2330_v0  ;;  %v2318_v55 = vsub.f32 %v2286_v34, %v2308_v9 }
 0x9c4   :  { %v2784_v61 = vpop.eup %2783 }
 0x9c5   :  { %v2332_v10 = vmul.f32 1.442695, %v2318_v55  ;;  %v2342_v58 = vsel %vm1415_vm6, %v2784_v61, 0.0 }
 0x9c6   :  { %2343 = vadd.xlane.f32.xlu0 %v2342_v58  ;;  %v2311_v18 = vpop.xlane.xlu1 %2310 }
 0x9c7   :  { %2791 = vpow2.f32 %v2332_v10  ;;  %v2319_v25 = vsub.f32 %v2287_v15, %v2311_v18 }
 0x9c8   :  { %v2786_v3 = vpop.eup %2785 }
 0x9c9   :  { %v2334_v30 = vmul.f32 1.442695, %v2319_v25  ;;  %v2345_v24 = vsel %vm1415_vm6, %v2786_v3, 0.0 }
 0x9ca   :  { %2346 = vadd.xlane.f32.xlu1 %v2345_v24 }
 0x9cb   :  { %2793 = vpow2.f32 %v2334_v30 }
 0x9cc   :  { %v2788_v8 = vpop.eup %2787 }
 0x9cd   :  { %v2348_v28 = vsel %vm1415_vm6, %v2788_v8, 0.0 }
 0x9ce   :  { %2349 = vadd.xlane.f32.xlu0 %v2348_v28 }
 0x9d0   :  { %v2790_v26 = vpop.eup %2789 }
 0x9d1   :  { %v2351_v13 = vsel %vm1415_vm6, %v2790_v26, 0.0 }
 0x9d2   :  { %2352 = vadd.xlane.f32.xlu1 %v2351_v13 }
 0x9d4   :  { %v2792_v16 = vpop.eup %2791 }
 0x9d5   :  { %v2354_v37 = vsel %vm1415_vm6, %v2792_v16, 0.0 }
 0x9d6   :  { %2355 = vadd.xlane.f32.xlu0 %v2354_v37 }
 0x9d8   :  { %v2794_v12 = vpop.eup %2793 }
 0x9d9   :  { %v2357_v36 = vsel %vm1415_vm6, %v2794_v12, 0.0 }
 0x9da   :  { %2358 = vadd.xlane.f32.xlu1 %v2357_v36 }
 0xa47   :  { %v2338_v34 = vpop.xlane.xlu0 %2337 }
 0xa48   :  { %2795 = vrcp.f32 %v2338_v34 }
 0xa4b   :  { %v2341_v23 = vpop.xlane.xlu1 %2340 }
 0xa4c   :  { %2797 = vrcp.f32 %v2341_v23 }
 0xa4f   :  { %v2344_v39 = vpop.xlane.xlu0 %2343 }
 0xa50   :  { %2799 = vrcp.f32 %v2344_v39 }
 0xa53   :  { %v2347_v43 = vpop.xlane.xlu1 %2346 }
 0xa54   :  { %2801 = vrcp.f32 %v2347_v43 }
 0xa55   :  { %v2796_v15 = vpop.eup %2795 }
 0xa56   :  { %v2361_v41 = vmul.f32 %v2796_v15, %v2780_v62 }
 0xa57   :  { %v2350_v4 = vpop.xlane.xlu0 %2349 }
 0xa58   :  { %2803 = vrcp.f32 %v2350_v4  ;;  %v2379_v44 = vrot.slane %v2361_v41, %v3054_v21  ;;  %v2386_v52 = vrot.slane %v2361_v41, %v3057_v22 }
 0xa59   :  { %v2798_v11 = vpop.eup %2797 }
 0xa5a   :  { %2381 = vbcast.lane.b32.xlu0 %v2379_v44, 256  ;;  %2388 = vbcast.lane.b32.xlu1 %v2386_v52, 256  ;;  %v2363_v46 = vmul.f32 %v2798_v11, %v2782_v45 }
 0xa5b   :  { %v2353_v42 = vpop.xlane.xlu1 %2352 }
 0xa5c   :  { %2805 = vrcp.f32 %v2353_v42  ;;  %v2400_v19 = vrot.slane %v2363_v46, %v3057_v22  ;;  %v2393_v40 = vrot.slane %v2363_v46, %v3054_v21 }
 0xa5d   :  { %v2800_v27 = vpop.eup %2799 }
 0xa5e   :  { %2402 = vbcast.lane.b32.xlu0 %v2400_v19, 256  ;;  %2395 = vbcast.lane.b32.xlu1 %v2393_v40, 256  ;;  %v2365_v20 = vmul.f32 %v2800_v27, %v2784_v61 }
 0xa5f   :  { %v2356_v54 = vpop.xlane.xlu0 %2355 }
 0xa60   :  { %2807 = vrcp.f32 %v2356_v54  ;;  %v2414_v53 = vrot.slane %v2365_v20, %v3057_v22  ;;  %v2407_v38 = vrot.slane %v2365_v20, %v3054_v21 }
 0xa61   :  { %v2802_v57 = vpop.eup %2801 }
 0xa62   :  { %2416 = vbcast.lane.b32.xlu0 %v2414_v53, 256  ;;  %2409 = vbcast.lane.b32.xlu1 %v2407_v38, 256  ;;  %v2367_v62 = vmul.f32 %v2802_v57, %v2786_v3 }
 0xa63   :  { %v2359_v1 = vpop.xlane.xlu1 %2358 }
 0xa64   :  { %2809 = vrcp.f32 %v2359_v1  ;;  %v2428_v35 = vrot.slane %v2367_v62, %v3057_v22  ;;  %v2421_v2 = vrot.slane %v2367_v62, %v3054_v21 }
 0xa65   :  { %v2804_v63 = vpop.eup %2803 }
 0xa66   :  { %2430 = vbcast.lane.b32.xlu0 %v2428_v35, 256  ;;  %2423 = vbcast.lane.b32.xlu1 %v2421_v2, 256  ;;  %v2369_v45 = vmul.f32 %v2804_v63, %v2788_v8 }
 0xa68   :  { %v2442_v0 = vrot.slane %v2369_v45, %v3057_v22  ;;  %v2435_v29 = vrot.slane %v2369_v45, %v3054_v21 }
 0xa69   :  { %v2806_v9 = vpop.eup %2805 }
 0xa6a   :  { %2444 = vbcast.lane.b32.xlu0 %v2442_v0, 256  ;;  %2437 = vbcast.lane.b32.xlu1 %v2435_v29, 256  ;;  %v2371_v55 = vmul.f32 %v2806_v9, %v2790_v26 }
 0xa6c   :  { %v2456_v61 = vrot.slane %v2371_v55, %v3057_v22  ;;  %v2449_v10 = vrot.slane %v2371_v55, %v3054_v21 }
 0xa6d   :  { %v2808_v58 = vpop.eup %2807 }
 0xa6e   :  { %2458 = vbcast.lane.b32.xlu0 %v2456_v61, 256  ;;  %2451 = vbcast.lane.b32.xlu1 %v2449_v10, 256  ;;  %v2373_v18 = vmul.f32 %v2808_v58, %v2792_v16 }
 0xa70   :  { %v2470_v25 = vrot.slane %v2373_v18, %v3057_v22  ;;  %v2463_v3 = vrot.slane %v2373_v18, %v3054_v21 }
 0xa71   :  { %v2810_v30 = vpop.eup %2809 }
 0xa72   :  { %2472 = vbcast.lane.b32.xlu0 %v2470_v25, 256  ;;  %2465 = vbcast.lane.b32.xlu1 %v2463_v3, 256  ;;  %v2375_v24 = vmul.f32 %v2810_v30, %v2794_v12 }
 0xa74   :  { %v2484_v8 = vrot.slane %v2375_v24, %v3057_v22  ;;  %v2477_v28 = vrot.slane %v2375_v24, %v3054_v21 }
 0xa76   :  { %2486 = vbcast.lane.b32.xlu0 %v2484_v8, 256  ;;  %2479 = vbcast.lane.b32.xlu1 %v2477_v28, 256 }
 0xacc   :  { %v2382_v26 = vpop.permute.xlu0 %2381  ;;  %v2389_v13 = vpop.permute.xlu1 %2388 }
 0xacd   :  { %v2488_v12 = vmul.f32 %v2382_v26, %v3077_v47  ;;  %v2489_v22 = vmul.f32 %v2389_v13, %v3088_v56 }
 0xacf   :  { %v2519_v47 = vsel %vm1102_vm5, %v2489_v22, 0.0 }
 0xad0   :  { %v2403_v37 = vpop.permute.xlu0 %2402  ;;  %v2396_v36 = vpop.permute.xlu1 %2395 }
 0xad1   :  { %v2491_v43 = vmul.f32 %v2403_v37, %v3092_v17  ;;  %v2490_v15 = vmul.f32 %v2396_v36, %v3079_v14  ;;  %v2504_v14 = vsel %vm1102_vm5, %v2488_v12, 0.0 }
 0xad3   :  { %v2520_v52 = vsel %vm1102_vm5, %v2491_v43, 0.0  ;;  %v2505_v11 = vsel %vm1102_vm5, %v2490_v15, 0.0 }
 0xad4   :  { %v2417_v34 = vpop.permute.xlu0 %2416  ;;  %v2410_v16 = vpop.permute.xlu1 %2409  ;;  %v2521_v19 = vadd.f32 %v2520_v52, %v2519_v47  ;;  %v2506_v40 = vadd.f32 %v2505_v11, %v2504_v14 }
 0xad5   :  { %v2493_v21 = vmul.f32 %v2417_v34, %v3100_v60  ;;  %v2492_v41 = vmul.f32 %v2410_v16, %v3082_v50 }
 0xad7   :  { %v2522_v56 = vsel %vm1102_vm5, %v2493_v21, 0.0  ;;  %v2507_v60 = vsel %vm1102_vm5, %v2492_v41, 0.0 }
 0xad8   :  { %v2431_v23 = vpop.permute.xlu0 %2430  ;;  %v2424_v39 = vpop.permute.xlu1 %2423  ;;  %v2523_v38 = vadd.f32 %v2522_v56, %v2521_v19  ;;  %v2508_v57 = vadd.f32 %v2507_v60, %v2506_v40 }
 0xad9   :  { %v2495_v46 = vmul.f32 %v2431_v23, %v3096_v59  ;;  %v2494_v17 = vmul.f32 %v2424_v39, %v3084_v51 }
 0xadb   :  { %v2524_v59 = vsel %vm1102_vm5, %v2495_v46, 0.0  ;;  %v2509_v51 = vsel %vm1102_vm5, %v2494_v17, 0.0 }
 0xadc   :  { %v2445_v4 = vpop.permute.xlu0 %2444  ;;  %v2438_v44 = vpop.permute.xlu1 %2437  ;;  %v2525_v1 = vadd.f32 %v2524_v59, %v2523_v38 }
 0xadd   :  { %v2497_v50 = vmul.f32 %v2445_v4, %v3124_v32  ;;  %v2496_v42 = vmul.f32 %v2438_v44, %v3106_v6  ;;  %v2510_v6 = vadd.f32 %v2509_v51, %v2508_v57 }
 0xadf   :  { %v2526_v62 = vsel %vm1102_vm5, %v2497_v50, 0.0  ;;  %v2511_v32 = vsel %vm1102_vm5, %v2496_v42, 0.0 }
 0xae0   :  { %v2459_v27 = vpop.permute.xlu0 %2458  ;;  %v2452_v20 = vpop.permute.xlu1 %2451  ;;  %v2527_v29 = vadd.f32 %v2526_v62, %v2525_v1 }
 0xae1   :  { %v2499_v54 = vmul.f32 %v2459_v27, %v3120_v31  ;;  %v2498_v53 = vmul.f32 %v2452_v20, %v3108_v7  ;;  %v2512_v7 = vadd.f32 %v2511_v32, %v2510_v6 }
 0xae3   :  { %v2528_v63 = vsel %vm1102_vm5, %v2499_v54, 0.0  ;;  %v2513_v45 = vsel %vm1102_vm5, %v2498_v53, 0.0 }
 0xae4   :  { %v2473_v35 = vpop.permute.xlu0 %2472  ;;  %v2466_v2 = vpop.permute.xlu1 %2465  ;;  %v2529_v61 = vadd.f32 %v2528_v63, %v2527_v29  ;;  %v2514_v10 = vadd.f32 %v2513_v45, %v2512_v7 }
 0xae5   :  { %v2501_v0 = vmul.f32 %v2473_v35, %v3146_v49  ;;  %v2500_v31 = vmul.f32 %v2466_v2, %v3126_v33 }
 0xae7   :  { %v2530_v9 = vsel %vm1102_vm5, %v2501_v0, 0.0  ;;  %v2515_v55 = vsel %vm1102_vm5, %v2500_v31, 0.0 }
 0xae8   :  { %v2487_v58 = vpop.permute.xlu0 %2486  ;;  %v2480_v18 = vpop.permute.xlu1 %2479  ;;  %v2531_v30 = vadd.f32 %v2530_v9, %v2529_v61  ;;  %v2516_v24 = vadd.f32 %v2515_v55, %v2514_v10 }
 0xae9   :  { %v2503_v25 = vmul.f32 %v2487_v58, %v3142_v48  ;;  %v2502_v3 = vmul.f32 %v2480_v18, %v3128_v5 }
 0xaeb   :  { %v2532_v49 = vsel %vm1102_vm5, %v2503_v25, 0.0  ;;  %v2517_v33 = vsel %vm1102_vm5, %v2502_v3, 0.0 }
 0xaec   :  { %v2533_v8 = vadd.f32 %v2532_v49, %v2531_v30  ;;  %v2518_v28 = vadd.f32 %v2517_v33, %v2516_v24 }
 0xaee   :  { %v2535_v26 = vmul.f32 %v2533_v8, %v2533_v8  ;;  %v2534_v13 = vmul.f32 %v2518_v28, %v2518_v28 }
 0xaf0   :  { %v2539_v37 = vsel %vm1102_vm5, %v2535_v26, 0.0  ;;  %v2536_v36 = vsel %vm1102_vm5, %v2534_v13, 0.0 }
 0xaf1   :  { %2540 = vadd.xlane.f32.xlu0 %v2539_v37  ;;  %2537 = vadd.xlane.f32.xlu1 %v2536_v36 }
 0xb7a   :  { %v2541_v34 = vpop.xlane.xlu0 %2540  ;;  %v2538_v48 = vpop.xlane.xlu1 %2537 }
 0xb7b   :  { %v2543_v16 = vadd.f32 1e-09, %v2541_v34  ;;  %v2549_v5 = vadd.f32 1.0, %v2541_v34  ;;  %v2542_v23 = vadd.f32 1e-09, %v2538_v48  ;;  %v2548_v39 = vadd.f32 1.0, %v2538_v48 }
 0xb7d   :  { %2811 = vrsqrt.f32 %v2543_v16 }
 0xb7e   :  { %2813 = vrcp.f32 %v2549_v5 }
 0xb7f   :  { %2815 = vrsqrt.f32 %v2542_v23 }
 0xb80   :  { %2817 = vrcp.f32 %v2548_v39 }
 0xb8a   :  { %v2812_v43 = vpop.eup %2811 }
 0xb8b   :  { %v2814_v15 = vpop.eup %2813  ;;  %v2547_v12 = vmul.f32 %v2812_v43, %v2541_v34 }
 0xb8c   :  { %v2816_v22 = vpop.eup %2815 }
 0xb8d   :  { %v2553_v21 = vmul.f32 %v2814_v15, %v2547_v12  ;;  %v2546_v41 = vmul.f32 %v2816_v22, %v2538_v48  ;;  %v2818_v4 = vpop.eup %2817 }
 0xb8f   :  { %v2555_v44 = vmul.f32 %v2553_v21, %v2533_v8  ;;  %v2551_v52 = vmul.f32 %v2818_v4, %v2546_v41 }
 0xb91   :  { %2557 = vst.msk [vmem:[#allocation8 + $0x4] sm:$0xf] %vm1102_vm5, %v2555_v44  ;;  %v2554_v11 = vmul.f32 %v2551_v52, %v2518_v28 }
 0xb93   :  { %2556 = vst.msk [vmem:[#allocation8] sm:$0xf] %vm1102_vm5, %v2554_v11 }
 0xb94   :  { %2870 = shalt.err (!%p2867_p0)
}
 0xb95   :  { %s2898_s29 = smov 64   ;;  %s2899_s30 = smov 4  }
 0xb96   :  { %2569 = dma.vmem_to_hbm [thread:$0]  %s2564_s27, 128, %s3630_s3, [#allocation5], %s2898_s29, %s2898_s29, %s2899_s30  }
 0xb97   :  { %2883 = dma.done.wait [#allocation5], 128  }
 0xb98   :  { %2884 = vsyncadd [#allocation5], 4294967168 }
 0xb99   :  { %2573 = vsyncpa [#allocation4], 1 }
 0xb9a   :  { %2574 = vsyncpa [#allocation7], 1 }
 0xb9b   :  { %2575 = vsyncpa [#allocation5], 1 }

</bundles_post_ra>
